<compile_context>
chip_gen: v5e
topology: v5e:2x2
jax: 0.10.0
libtpu: 0.0.40
codegen_flags: <defaults>
</compile_context>

<pallas_src>
import functools

import jax
import jax.numpy as jnp
from jax import lax
from jax.experimental import pallas as pl
from jax.experimental.pallas import tpu as pltpu

LANE = 128


def _round_up(x, m):
    return (x + m - 1) // m * m


# ----------------------------------------------------------------------------
# Fused kernel: one-hot embedding + stacked LSTM (layer-major) + final FC.
# ----------------------------------------------------------------------------
def _fused_poetry_lstm_kernel(tok_ref, emb_ref, *refs,
                              num_layers, seq_len, batch, vocab, hidden):
    L, T, B, V, H = num_layers, seq_len, batch, vocab, hidden
    TB = T * B

    w_ih_refs = [refs[3 * l + 0] for l in range(L)]   # bf16 (in_l, 4H)
    w_hh_refs = [refs[3 * l + 1] for l in range(L)]   # bf16 (H, 4H)
    b_refs    = [refs[3 * l + 2] for l in range(L)]   # f32  (1, 4H)
    fc_w_ref  = refs[3 * L + 0]                       # bf16 (H, VP)
    fc_b_ref  = refs[3 * L + 1]                       # f32  (1, VP)
    out_ref   = refs[3 * L + 2]                       # f32  (B, VP)  lane-dense
    h_out_ref = refs[3 * L + 3]                       # f32  (L, B, H)
    c_out_ref = refs[3 * L + 4]                       # f32  (L, B, H)
    pre_ref   = refs[3 * L + 5]                       # VMEM scratch (TB, 4H) f32
    xseq_ref  = refs[3 * L + 6]                       # VMEM scratch (TB, H)  f32

    # ---- Embedding gather for ALL T*B tokens as one exact one-hot matmul ----
    tok = tok_ref[...]                                            # (TB, 1) int32
    vocab_iota = lax.broadcasted_iota(jnp.int32, (TB, V), 1)
    onehot = (tok == vocab_iota).astype(jnp.float32)              # (TB, V)
    x_all = jnp.dot(onehot, emb_ref[...],
                    preferred_element_type=jnp.float32)           # (TB, E) f32

    # Lane mask selecting the `g` (cell-candidate) gate inside the packed block.
    gate_iota = lax.broadcasted_iota(jnp.int32, (B, 4 * H), 1)
    g_mask = (gate_iota >= 2 * H) & (gate_iota < 3 * H)

    h = None
    c = None
    for l in range(L):
        # Batched input-to-hidden pre-gates for all timesteps (+ bias), hoisted
        # off the serial recurrence; stashed in VMEM, per-step rows read back.
        pre_ref[...] = (jnp.dot(x_all.astype(jnp.bfloat16), w_ih_refs[l][...],
                                preferred_element_type=jnp.float32)
                        + b_refs[l][...])                         # (TB, 4H)

        w_hh = w_hh_refs[l][...]                                  # (H, 4H) bf16
        h = jnp.zeros((B, H), jnp.float32)
        c = jnp.zeros((B, H), jnp.float32)

        # Statically unrolled recurrence: ONE small MXU matmul per step.
        for t in range(T):
            z = (pre_ref[t * B:(t + 1) * B, :]
                 + jnp.dot(h.astype(jnp.bfloat16), w_hh,
                           preferred_element_type=jnp.float32))   # (B, 4H) f32
            sg = jax.nn.sigmoid(z)
            th = jnp.tanh(z)
            act = jnp.where(g_mask, th, sg)                       # packed i|f|g|o
            i_g = act[:, 0 * H:1 * H]
            f_g = act[:, 1 * H:2 * H]
            g_g = act[:, 2 * H:3 * H]
            o_g = act[:, 3 * H:4 * H]
            c = f_g * c + i_g * g_g
            h = o_g * jnp.tanh(c)
            if l < L - 1:
                xseq_ref[t * B:(t + 1) * B, :] = h                # next layer input

        if l < L - 1:
            x_all = xseq_ref[...]                                 # (TB, H)
        h_out_ref[l] = h
        c_out_ref[l] = c

    # Final FC on the last timestep's top-layer hidden (== PyTorch out[:, -1]).
    out_ref[...] = (jnp.dot(h.astype(jnp.bfloat16), fc_w_ref[...],
                            preferred_element_type=jnp.float32)
                    + fc_b_ref[...])


# ----------------------------------------------------------------------------
# Wrapper: single pallas_call, full-array blocks (everything fits in VMEM).
# ----------------------------------------------------------------------------
def poetry_lstm_forward(params, X, *, hidden_size):
    """X: (B, T) int token ids. Returns (out (B,V), h (L,B,H), c (L,B,H))."""
    emb = params["embedding"]                          # (V, E) f32
    vocab_size, _ = emb.shape
    L = len(params["lstm"])
    H = hidden_size
    VP = params["fc1_b"].shape[1]                      # padded vocab (lane-dense)
    B, T = X.shape

    # Time-major flattened tokens: row t*B + b  <->  (timestep t, batch b).
    tokens = jnp.transpose(X, (1, 0)).reshape(T * B, 1).astype(jnp.int32)

    kernel = functools.partial(
        _fused_poetry_lstm_kernel,
        num_layers=L, seq_len=T, batch=B, vocab=vocab_size, hidden=H)

    args = [tokens, emb]
    in_specs = [
        pl.BlockSpec((T * B, 1), lambda i: (0, 0)),
        pl.BlockSpec(emb.shape, lambda i: (0, 0)),
    ]
    for layer in params["lstm"]:
        for name in ("w_ih_t", "w_hh_t", "bias"):
            w = layer[name]
            args.append(w)
            in_specs.append(pl.BlockSpec(w.shape, lambda i: (0, 0)))
    for name in ("fc1_w_t", "fc1_b"):
        w = params[name]
        args.append(w)
        in_specs.append(pl.BlockSpec(w.shape, lambda i: (0, 0)))

    out_pad, h, c = pl.pallas_call(
        kernel,
        out_shape=(
            jax.ShapeDtypeStruct((B, VP), jnp.float32),
            jax.ShapeDtypeStruct((L, B, H), jnp.float32),
            jax.ShapeDtypeStruct((L, B, H), jnp.float32),
        ),
        grid_spec=pltpu.PrefetchScalarGridSpec(
            num_scalar_prefetch=0,
            grid=(1,),
            in_specs=in_specs,
            out_specs=[
                pl.BlockSpec((B, VP), lambda i: (0, 0)),
                pl.BlockSpec((L, B, H), lambda i: (0, 0, 0)),
                pl.BlockSpec((L, B, H), lambda i: (0, 0, 0)),
            ],
            scratch_shapes=[
                pltpu.VMEM((T * B, 4 * H), jnp.float32),   # pre-gates (per layer)
                pltpu.VMEM((T * B, H), jnp.float32),       # inter-layer h sequence
            ],
        ),
        compiler_params=pltpu.CompilerParams(
            dimension_semantics=("arbitrary",)),
    )(*args)

    return out_pad[:, :vocab_size], h, c


# ----------------------------------------------------------------------------
# Parameter construction (PyTorch-like uniform(-1/sqrt(H), 1/sqrt(H))) in the
# transposed, gate-packed layout the kernel expects. Gate order: i, f, g, o.
# ----------------------------------------------------------------------------
def init_params(key, vocab_size, embedding_dim, hidden_size, num_layers):
    H = hidden_size
    VP = _round_up(vocab_size, LANE)
    ks = jax.random.split(key, 1 + 4 * num_layers + 2)
    k_iter = iter(ks)
    bound = hidden_size ** -0.5

    params = {
        "embedding": jax.random.normal(next(k_iter),
                                       (vocab_size, embedding_dim), jnp.float32),
        "lstm": [],
    }
    for layer_idx in range(num_layers):
        in_size = embedding_dim if layer_idx == 0 else hidden_size
        w_ih = jax.random.uniform(next(k_iter), (4 * H, in_size),
                                  jnp.float32, -bound, bound)
        w_hh = jax.random.uniform(next(k_iter), (4 * H, H),
                                  jnp.float32, -bound, bound)
        b_ih = jax.random.uniform(next(k_iter), (4 * H,),
                                  jnp.float32, -bound, bound)
        b_hh = jax.random.uniform(next(k_iter), (4 * H,),
                                  jnp.float32, -bound, bound)
        params["lstm"].append({
            "w_ih_t": w_ih.T.astype(jnp.bfloat16),        # (in, 4H)  unpadded
            "w_hh_t": w_hh.T.astype(jnp.bfloat16),        # (H, 4H)   unpadded
            "bias": (b_ih + b_hh)[None, :],               # (1, 4H)   f32
        })

    fc_w = jax.random.uniform(next(k_iter), (vocab_size, H),
                              jnp.float32, -bound, bound)
    fc_b = jax.random.uniform(next(k_iter), (vocab_size,),
                              jnp.float32, -bound, bound)
    params["fc1_w_t"] = (jnp.zeros((H, VP), jnp.float32)
                         .at[:, :vocab_size].set(fc_w.T)).astype(jnp.bfloat16)
    params["fc1_b"] = jnp.zeros((1, VP), jnp.float32).at[0, :vocab_size].set(fc_b)
    return params


# ----------------------------------------------------------------------------
# Pure-JAX reference (same bf16-quantized weights / eval-mode semantics).
# ----------------------------------------------------------------------------
def reference_forward(params, X, hidden_size):
    emb = params["embedding"]
    V = emb.shape[0]
    H = hidden_size
    L = len(params["lstm"])
    B, T = X.shape
    x = emb[X]                                            # (B, T, E)

    def q(v):  # match the kernel's bf16 matmul-operand quantization
        return v.astype(jnp.bfloat16).astype(jnp.float32)

    h_fin, c_fin = [], []
    layer_in = x
    for l in range(L):
        w_ih = params["lstm"][l]["w_ih_t"].astype(jnp.float32)
        w_hh = params["lstm"][l]["w_hh_t"].astype(jnp.float32)
        b = params["lstm"][l]["bias"][0]
        h = jnp.zeros((B, H), jnp.float32)
        c = jnp.zeros((B, H), jnp.float32)
        outs = []
        for t in range(T):
            z = q(layer_in[:, t]) @ w_ih + q(h) @ w_hh + b
            i = jax.nn.sigmoid(z[:, 0 * H:1 * H])
            f = jax.nn.sigmoid(z[:, 1 * H:2 * H])
            g = jnp.tanh(z[:, 2 * H:3 * H])
            o = jax.nn.sigmoid(z[:, 3 * H:4 * H])
            c = f * c + i * g
            h = o * jnp.tanh(c)
            outs.append(h)
        layer_in = jnp.stack(outs, axis=1)
        h_fin.append(h)
        c_fin.append(c)
    logits = (q(h_fin[-1]) @ params["fc1_w_t"].astype(jnp.float32)
              + params["fc1_b"][0])[:, :V]
    return logits, jnp.stack(h_fin), jnp.stack(c_fin)


if __name__ == "__main__":
    vocab_size = 64
    embedding_dim = 32
    hidden_size = 32
    num_layers = 2
    batch = 2
    seq_len = 8

    key = jax.random.PRNGKey(0)
    k_params, k_tokens = jax.random.split(key)
    params = init_params(k_params, vocab_size, embedding_dim,
                         hidden_size, num_layers)
    X = jax.random.randint(k_tokens, (batch, seq_len), 0, vocab_size, jnp.int32)

    fwd = jax.jit(functools.partial(poetry_lstm_forward, hidden_size=hidden_size))
    out, h, c = fwd(params, X)
    jax.block_until_ready((out, h, c))

    assert out.shape == (batch, vocab_size)
    assert h.shape == (num_layers, batch, hidden_size)
    assert c.shape == (num_layers, batch, hidden_size)

    ref_out, ref_h, ref_c = reference_forward(params, X, hidden_size)
    assert jnp.allclose(out, ref_out, atol=2e-2, rtol=2e-2), "logits mismatch"
    assert jnp.allclose(h, ref_h, atol=2e-2, rtol=2e-2), "hidden-state mismatch"
    assert jnp.allclose(c, ref_c, atol=2e-2, rtol=2e-2), "cell-state mismatch"

    print("KERNEL_OK")
</pallas_src>

<mosaic_0001>
module attributes {stable_mosaic.version = 11 : i64} {
  func.func @_fused_poetry_lstm_kernel(%arg0: i32, %arg1: memref<16x1xi32, #tpu.memory_space<vmem>>, %arg2: memref<64x32xf32, #tpu.memory_space<vmem>>, %arg3: memref<32x128xbf16, #tpu.memory_space<vmem>>, %arg4: memref<32x128xbf16, #tpu.memory_space<vmem>>, %arg5: memref<1x128xf32, #tpu.memory_space<vmem>>, %arg6: memref<32x128xbf16, #tpu.memory_space<vmem>>, %arg7: memref<32x128xbf16, #tpu.memory_space<vmem>>, %arg8: memref<1x128xf32, #tpu.memory_space<vmem>>, %arg9: memref<32x128xbf16, #tpu.memory_space<vmem>>, %arg10: memref<1x128xf32, #tpu.memory_space<vmem>>, %arg11: memref<2x128xf32, #tpu.memory_space<vmem>>, %arg12: memref<2x2x32xf32, #tpu.memory_space<vmem>>, %arg13: memref<2x2x32xf32, #tpu.memory_space<vmem>>, %arg14: memref<16x128xf32, #tpu.memory_space<vmem>>, %arg15: memref<16x32xf32, #tpu.memory_space<vmem>>) attributes {dimension_semantics = [#tpu.dimension_semantics<arbitrary>], iteration_bounds = array<i64: 1>, scalar_prefetch = 0 : i64, scratch_operands = 2 : i64, tpu.core_type = #tpu.core_type<tc>, window_params = [{pipeline_mode = #tpu.pipeline_mode<synchronous>, transform_indices = @transform_0, window_bounds = array<i64: 16, 1>}, {pipeline_mode = #tpu.pipeline_mode<synchronous>, transform_indices = @transform_1, window_bounds = array<i64: 64, 32>}, {pipeline_mode = #tpu.pipeline_mode<synchronous>, transform_indices = @transform_2, window_bounds = array<i64: 32, 128>}, {pipeline_mode = #tpu.pipeline_mode<synchronous>, transform_indices = @transform_3, window_bounds = array<i64: 32, 128>}, {pipeline_mode = #tpu.pipeline_mode<synchronous>, transform_indices = @transform_4, window_bounds = array<i64: 1, 128>}, {pipeline_mode = #tpu.pipeline_mode<synchronous>, transform_indices = @transform_5, window_bounds = array<i64: 32, 128>}, {pipeline_mode = #tpu.pipeline_mode<synchronous>, transform_indices = @transform_6, window_bounds = array<i64: 32, 128>}, {pipeline_mode = #tpu.pipeline_mode<synchronous>, transform_indices = @transform_7, window_bounds = array<i64: 1, 128>}, {pipeline_mode = #tpu.pipeline_mode<synchronous>, transform_indices = @transform_8, window_bounds = array<i64: 32, 128>}, {pipeline_mode = #tpu.pipeline_mode<synchronous>, transform_indices = @transform_9, window_bounds = array<i64: 1, 128>}, {pipeline_mode = #tpu.pipeline_mode<synchronous>, transform_indices = @transform_10, window_bounds = array<i64: 2, 128>}, {pipeline_mode = #tpu.pipeline_mode<synchronous>, transform_indices = @transform_11, window_bounds = array<i64: 2, 2, 32>}, {pipeline_mode = #tpu.pipeline_mode<synchronous>, transform_indices = @transform_12, window_bounds = array<i64: 2, 2, 32>}]} {
    %c0 = arith.constant 0 : index
    %c0_0 = arith.constant 0 : index
    %0 = vector.load %arg1[%c0, %c0_0] : memref<16x1xi32, #tpu.memory_space<vmem>>, vector<16x1xi32>
    %1 = tpu.iota {dimensions = array<i32: 1>} : vector<16x64xi32>
    %2 = vector.broadcast %0 : vector<16x1xi32> to vector<16x64xi32>
    %3 = arith.cmpi eq, %2, %1 : vector<16x64xi32>
    %4 = arith.extui %3 : vector<16x64xi1> to vector<16x64xi32>
    %5 = arith.sitofp %4 : vector<16x64xi32> to vector<16x64xf32>
    %c0_1 = arith.constant 0 : index
    %c0_2 = arith.constant 0 : index
    %6 = vector.load %arg2[%c0_1, %c0_2] : memref<64x32xf32, #tpu.memory_space<vmem>>, vector<64x32xf32>
    %cst = arith.constant dense<0.000000e+00> : vector<16x32xf32>
    %7 = tpu.matmul %5, %6, %cst {dimension_numbers = #tpu.dot_dimension_numbers<[1], [0], [0], [1], [0, 0, 1, 1], [], []>} : vector<16x64xf32>, vector<64x32xf32>, vector<16x32xf32> -> vector<16x32xf32>
    %8 = tpu.iota {dimensions = array<i32: 1>} : vector<2x128xi32>
    %c64_i32 = arith.constant 64 : i32
    %9 = vector.broadcast %c64_i32 : i32 to vector<2x128xi32>
    %10 = arith.cmpi sge, %8, %9 : vector<2x128xi32>
    %c96_i32 = arith.constant 96 : i32
    %11 = vector.broadcast %c96_i32 : i32 to vector<2x128xi32>
    %12 = arith.cmpi slt, %8, %11 : vector<2x128xi32>
    %13 = arith.andi %10, %12 : vector<2x128xi1>
    %14 = arith.truncf %7 : vector<16x32xf32> to vector<16x32xbf16>
    %c0_3 = arith.constant 0 : index
    %c0_4 = arith.constant 0 : index
    %15 = vector.load %arg3[%c0_3, %c0_4] : memref<32x128xbf16, #tpu.memory_space<vmem>>, vector<32x128xbf16>
    %cst_5 = arith.constant dense<0.000000e+00> : vector<16x128xf32>
    %16 = tpu.matmul %14, %15, %cst_5 {dimension_numbers = #tpu.dot_dimension_numbers<[1], [0], [0], [1], [0, 0, 1, 1], [], []>} : vector<16x32xbf16>, vector<32x128xbf16>, vector<16x128xf32> -> vector<16x128xf32>
    %c0_6 = arith.constant 0 : index
    %c0_7 = arith.constant 0 : index
    %17 = vector.load %arg5[%c0_6, %c0_7] : memref<1x128xf32, #tpu.memory_space<vmem>>, vector<1x128xf32>
    %18 = vector.broadcast %17 : vector<1x128xf32> to vector<16x128xf32>
    %19 = arith.addf %16, %18 : vector<16x128xf32>
    %c0_8 = arith.constant 0 : index
    %c0_9 = arith.constant 0 : index
    %20 = vector.load %arg14[%c0_8, %c0_9] : memref<16x128xf32, #tpu.memory_space<vmem>>, vector<16x128xf32>
    tpu.vector_store %arg14[%c0_8, %c0_9], %19 {strides = array<i32>} : memref<16x128xf32, #tpu.memory_space<vmem>>, vector<16x128xf32>,
    %c0_10 = arith.constant 0 : index
    %c0_11 = arith.constant 0 : index
    %21 = vector.load %arg4[%c0_10, %c0_11] : memref<32x128xbf16, #tpu.memory_space<vmem>>, vector<32x128xbf16>
    %cst_12 = arith.constant 0.000000e+00 : f32
    %22 = vector.broadcast %cst_12 : f32 to vector<2x32xf32>
    %cst_13 = arith.constant 0.000000e+00 : f32
    %23 = vector.broadcast %cst_13 : f32 to vector<2x32xf32>
    %c0_14 = arith.constant 0 : index
    %c0_15 = arith.constant 0 : index
    %24 = vector.load %arg14[%c0_14, %c0_15] : memref<16x128xf32, #tpu.memory_space<vmem>>, vector<2x128xf32>
    %25 = arith.truncf %22 : vector<2x32xf32> to vector<2x32xbf16>
    %cst_16 = arith.constant dense<0.000000e+00> : vector<2x128xf32>
    %26 = tpu.matmul %25, %21, %cst_16 {dimension_numbers = #tpu.dot_dimension_numbers<[1], [0], [0], [1], [0, 0, 1, 1], [], []>} : vector<2x32xbf16>, vector<32x128xbf16>, vector<2x128xf32> -> vector<2x128xf32>
    %27 = arith.addf %24, %26 : vector<2x128xf32>
    %28 = arith.negf %27 : vector<2x128xf32>
    %29 = math.exp %28 : vector<2x128xf32>
    %cst_17 = arith.constant 1.000000e+00 : f32
    %30 = vector.broadcast %cst_17 : f32 to vector<2x128xf32>
    %31 = arith.addf %30, %29 : vector<2x128xf32>
    %32 = arith.divf %30, %31 : vector<2x128xf32>
    %33 = math.tanh %27 : vector<2x128xf32>
    %34 = arith.select %13, %33, %32 : vector<2x128xi1>, vector<2x128xf32>
    %35 = vector.extract_strided_slice %34 {offsets = [0, 0], sizes = [2, 32], strides = [1, 1]} : vector<2x128xf32> to vector<2x32xf32>
    %36 = vector.extract_strided_slice %34 {offsets = [0, 32], sizes = [2, 32], strides = [1, 1]} : vector<2x128xf32> to vector<2x32xf32>
    %37 = vector.extract_strided_slice %34 {offsets = [0, 64], sizes = [2, 32], strides = [1, 1]} : vector<2x128xf32> to vector<2x32xf32>
    %38 = vector.extract_strided_slice %34 {offsets = [0, 96], sizes = [2, 32], strides = [1, 1]} : vector<2x128xf32> to vector<2x32xf32>
    %39 = arith.mulf %36, %23 : vector<2x32xf32>
    %40 = arith.mulf %35, %37 : vector<2x32xf32>
    %41 = arith.addf %39, %40 : vector<2x32xf32>
    %42 = math.tanh %41 : vector<2x32xf32>
    %43 = arith.mulf %38, %42 : vector<2x32xf32>
    %c0_18 = arith.constant 0 : index
    %c0_19 = arith.constant 0 : index
    %44 = vector.load %arg15[%c0_18, %c0_19] : memref<16x32xf32, #tpu.memory_space<vmem>>, vector<2x32xf32>
    tpu.vector_store %arg15[%c0_18, %c0_19], %43 {strides = array<i32>} : memref<16x32xf32, #tpu.memory_space<vmem>>, vector<2x32xf32>,
    %c2 = arith.constant 2 : index
    %c0_20 = arith.constant 0 : index
    %45 = vector.load %arg14[%c2, %c0_20] : memref<16x128xf32, #tpu.memory_space<vmem>>, vector<2x128xf32>
    %46 = arith.truncf %43 : vector<2x32xf32> to vector<2x32xbf16>
    %cst_21 = arith.constant dense<0.000000e+00> : vector<2x128xf32>
    %47 = tpu.matmul %46, %21, %cst_21 {dimension_numbers = #tpu.dot_dimension_numbers<[1], [0], [0], [1], [0, 0, 1, 1], [], []>} : vector<2x32xbf16>, vector<32x128xbf16>, vector<2x128xf32> -> vector<2x128xf32>
    %48 = arith.addf %45, %47 : vector<2x128xf32>
    %49 = arith.negf %48 : vector<2x128xf32>
    %50 = math.exp %49 : vector<2x128xf32>
    %cst_22 = arith.constant 1.000000e+00 : f32
    %51 = vector.broadcast %cst_22 : f32 to vector<2x128xf32>
    %52 = arith.addf %51, %50 : vector<2x128xf32>
    %53 = arith.divf %51, %52 : vector<2x128xf32>
    %54 = math.tanh %48 : vector<2x128xf32>
    %55 = arith.select %13, %54, %53 : vector<2x128xi1>, vector<2x128xf32>
    %56 = vector.extract_strided_slice %55 {offsets = [0, 0], sizes = [2, 32], strides = [1, 1]} : vector<2x128xf32> to vector<2x32xf32>
    %57 = vector.extract_strided_slice %55 {offsets = [0, 32], sizes = [2, 32], strides = [1, 1]} : vector<2x128xf32> to vector<2x32xf32>
    %58 = vector.extract_strided_slice %55 {offsets = [0, 64], sizes = [2, 32], strides = [1, 1]} : vector<2x128xf32> to vector<2x32xf32>
    %59 = vector.extract_strided_slice %55 {offsets = [0, 96], sizes = [2, 32], strides = [1, 1]} : vector<2x128xf32> to vector<2x32xf32>
    %60 = arith.mulf %57, %41 : vector<2x32xf32>
    %61 = arith.mulf %56, %58 : vector<2x32xf32>
    %62 = arith.addf %60, %61 : vector<2x32xf32>
    %63 = math.tanh %62 : vector<2x32xf32>
    %64 = arith.mulf %59, %63 : vector<2x32xf32>
    %c2_23 = arith.constant 2 : index
    %c0_24 = arith.constant 0 : index
    %65 = vector.load %arg15[%c2_23, %c0_24] : memref<16x32xf32, #tpu.memory_space<vmem>>, vector<2x32xf32>
    tpu.vector_store %arg15[%c2_23, %c0_24], %64 {strides = array<i32>} : memref<16x32xf32, #tpu.memory_space<vmem>>, vector<2x32xf32>,
    %c4 = arith.constant 4 : index
    %c0_25 = arith.constant 0 : index
    %66 = vector.load %arg14[%c4, %c0_25] : memref<16x128xf32, #tpu.memory_space<vmem>>, vector<2x128xf32>
    %67 = arith.truncf %64 : vector<2x32xf32> to vector<2x32xbf16>
    %cst_26 = arith.constant dense<0.000000e+00> : vector<2x128xf32>
    %68 = tpu.matmul %67, %21, %cst_26 {dimension_numbers = #tpu.dot_dimension_numbers<[1], [0], [0], [1], [0, 0, 1, 1], [], []>} : vector<2x32xbf16>, vector<32x128xbf16>, vector<2x128xf32> -> vector<2x128xf32>
    %69 = arith.addf %66, %68 : vector<2x128xf32>
    %70 = arith.negf %69 : vector<2x128xf32>
    %71 = math.exp %70 : vector<2x128xf32>
    %cst_27 = arith.constant 1.000000e+00 : f32
    %72 = vector.broadcast %cst_27 : f32 to vector<2x128xf32>
    %73 = arith.addf %72, %71 : vector<2x128xf32>
    %74 = arith.divf %72, %73 : vector<2x128xf32>
    %75 = math.tanh %69 : vector<2x128xf32>
    %76 = arith.select %13, %75, %74 : vector<2x128xi1>, vector<2x128xf32>
    %77 = vector.extract_strided_slice %76 {offsets = [0, 0], sizes = [2, 32], strides = [1, 1]} : vector<2x128xf32> to vector<2x32xf32>
    %78 = vector.extract_strided_slice %76 {offsets = [0, 32], sizes = [2, 32], strides = [1, 1]} : vector<2x128xf32> to vector<2x32xf32>
    %79 = vector.extract_strided_slice %76 {offsets = [0, 64], sizes = [2, 32], strides = [1, 1]} : vector<2x128xf32> to vector<2x32xf32>
    %80 = vector.extract_strided_slice %76 {offsets = [0, 96], sizes = [2, 32], strides = [1, 1]} : vector<2x128xf32> to vector<2x32xf32>
    %81 = arith.mulf %78, %62 : vector<2x32xf32>
    %82 = arith.mulf %77, %79 : vector<2x32xf32>
    %83 = arith.addf %81, %82 : vector<2x32xf32>
    %84 = math.tanh %83 : vector<2x32xf32>
    %85 = arith.mulf %80, %84 : vector<2x32xf32>
    %c4_28 = arith.constant 4 : index
    %c0_29 = arith.constant 0 : index
    %86 = vector.load %arg15[%c4_28, %c0_29] : memref<16x32xf32, #tpu.memory_space<vmem>>, vector<2x32xf32>
    tpu.vector_store %arg15[%c4_28, %c0_29], %85 {strides = array<i32>} : memref<16x32xf32, #tpu.memory_space<vmem>>, vector<2x32xf32>,
    %c6 = arith.constant 6 : index
    %c0_30 = arith.constant 0 : index
    %87 = vector.load %arg14[%c6, %c0_30] : memref<16x128xf32, #tpu.memory_space<vmem>>, vector<2x128xf32>
    %88 = arith.truncf %85 : vector<2x32xf32> to vector<2x32xbf16>
    %cst_31 = arith.constant dense<0.000000e+00> : vector<2x128xf32>
    %89 = tpu.matmul %88, %21, %cst_31 {dimension_numbers = #tpu.dot_dimension_numbers<[1], [0], [0], [1], [0, 0, 1, 1], [], []>} : vector<2x32xbf16>, vector<32x128xbf16>, vector<2x128xf32> -> vector<2x128xf32>
    %90 = arith.addf %87, %89 : vector<2x128xf32>
    %91 = arith.negf %90 : vector<2x128xf32>
    %92 = math.exp %91 : vector<2x128xf32>
    %cst_32 = arith.constant 1.000000e+00 : f32
    %93 = vector.broadcast %cst_32 : f32 to vector<2x128xf32>
    %94 = arith.addf %93, %92 : vector<2x128xf32>
    %95 = arith.divf %93, %94 : vector<2x128xf32>
    %96 = math.tanh %90 : vector<2x128xf32>
    %97 = arith.select %13, %96, %95 : vector<2x128xi1>, vector<2x128xf32>
    %98 = vector.extract_strided_slice %97 {offsets = [0, 0], sizes = [2, 32], strides = [1, 1]} : vector<2x128xf32> to vector<2x32xf32>
    %99 = vector.extract_strided_slice %97 {offsets = [0, 32], sizes = [2, 32], strides = [1, 1]} : vector<2x128xf32> to vector<2x32xf32>
    %100 = vector.extract_strided_slice %97 {offsets = [0, 64], sizes = [2, 32], strides = [1, 1]} : vector<2x128xf32> to vector<2x32xf32>
    %101 = vector.extract_strided_slice %97 {offsets = [0, 96], sizes = [2, 32], strides = [1, 1]} : vector<2x128xf32> to vector<2x32xf32>
    %102 = arith.mulf %99, %83 : vector<2x32xf32>
    %103 = arith.mulf %98, %100 : vector<2x32xf32>
    %104 = arith.addf %102, %103 : vector<2x32xf32>
    %105 = math.tanh %104 : vector<2x32xf32>
    %106 = arith.mulf %101, %105 : vector<2x32xf32>
    %c6_33 = arith.constant 6 : index
    %c0_34 = arith.constant 0 : index
    %107 = vector.load %arg15[%c6_33, %c0_34] : memref<16x32xf32, #tpu.memory_space<vmem>>, vector<2x32xf32>
    tpu.vector_store %arg15[%c6_33, %c0_34], %106 {strides = array<i32>} : memref<16x32xf32, #tpu.memory_space<vmem>>, vector<2x32xf32>,
    %c8 = arith.constant 8 : index
    %c0_35 = arith.constant 0 : index
    %108 = vector.load %arg14[%c8, %c0_35] : memref<16x128xf32, #tpu.memory_space<vmem>>, vector<2x128xf32>
    %109 = arith.truncf %106 : vector<2x32xf32> to vector<2x32xbf16>
    %cst_36 = arith.constant dense<0.000000e+00> : vector<2x128xf32>
    %110 = tpu.matmul %109, %21, %cst_36 {dimension_numbers = #tpu.dot_dimension_numbers<[1], [0], [0], [1], [0, 0, 1, 1], [], []>} : vector<2x32xbf16>, vector<32x128xbf16>, vector<2x128xf32> -> vector<2x128xf32>
    %111 = arith.addf %108, %110 : vector<2x128xf32>
    %112 = arith.negf %111 : vector<2x128xf32>
    %113 = math.exp %112 : vector<2x128xf32>
    %cst_37 = arith.constant 1.000000e+00 : f32
    %114 = vector.broadcast %cst_37 : f32 to vector<2x128xf32>
    %115 = arith.addf %114, %113 : vector<2x128xf32>
    %116 = arith.divf %114, %115 : vector<2x128xf32>
    %117 = math.tanh %111 : vector<2x128xf32>
    %118 = arith.select %13, %117, %116 : vector<2x128xi1>, vector<2x128xf32>
    %119 = vector.extract_strided_slice %118 {offsets = [0, 0], sizes = [2, 32], strides = [1, 1]} : vector<2x128xf32> to vector<2x32xf32>
    %120 = vector.extract_strided_slice %118 {offsets = [0, 32], sizes = [2, 32], strides = [1, 1]} : vector<2x128xf32> to vector<2x32xf32>
    %121 = vector.extract_strided_slice %118 {offsets = [0, 64], sizes = [2, 32], strides = [1, 1]} : vector<2x128xf32> to vector<2x32xf32>
    %122 = vector.extract_strided_slice %118 {offsets = [0, 96], sizes = [2, 32], strides = [1, 1]} : vector<2x128xf32> to vector<2x32xf32>
    %123 = arith.mulf %120, %104 : vector<2x32xf32>
    %124 = arith.mulf %119, %121 : vector<2x32xf32>
    %125 = arith.addf %123, %124 : vector<2x32xf32>
    %126 = math.tanh %125 : vector<2x32xf32>
    %127 = arith.mulf %122, %126 : vector<2x32xf32>
    %c8_38 = arith.constant 8 : index
    %c0_39 = arith.constant 0 : index
    %128 = vector.load %arg15[%c8_38, %c0_39] : memref<16x32xf32, #tpu.memory_space<vmem>>, vector<2x32xf32>
    tpu.vector_store %arg15[%c8_38, %c0_39], %127 {strides = array<i32>} : memref<16x32xf32, #tpu.memory_space<vmem>>, vector<2x32xf32>,
    %c10 = arith.constant 10 : index
    %c0_40 = arith.constant 0 : index
    %129 = vector.load %arg14[%c10, %c0_40] : memref<16x128xf32, #tpu.memory_space<vmem>>, vector<2x128xf32>
    %130 = arith.truncf %127 : vector<2x32xf32> to vector<2x32xbf16>
    %cst_41 = arith.constant dense<0.000000e+00> : vector<2x128xf32>
    %131 = tpu.matmul %130, %21, %cst_41 {dimension_numbers = #tpu.dot_dimension_numbers<[1], [0], [0], [1], [0, 0, 1, 1], [], []>} : vector<2x32xbf16>, vector<32x128xbf16>, vector<2x128xf32> -> vector<2x128xf32>
    %132 = arith.addf %129, %131 : vector<2x128xf32>
    %133 = arith.negf %132 : vector<2x128xf32>
    %134 = math.exp %133 : vector<2x128xf32>
    %cst_42 = arith.constant 1.000000e+00 : f32
    %135 = vector.broadcast %cst_42 : f32 to vector<2x128xf32>
    %136 = arith.addf %135, %134 : vector<2x128xf32>
    %137 = arith.divf %135, %136 : vector<2x128xf32>
    %138 = math.tanh %132 : vector<2x128xf32>
    %139 = arith.select %13, %138, %137 : vector<2x128xi1>, vector<2x128xf32>
    %140 = vector.extract_strided_slice %139 {offsets = [0, 0], sizes = [2, 32], strides = [1, 1]} : vector<2x128xf32> to vector<2x32xf32>
    %141 = vector.extract_strided_slice %139 {offsets = [0, 32], sizes = [2, 32], strides = [1, 1]} : vector<2x128xf32> to vector<2x32xf32>
    %142 = vector.extract_strided_slice %139 {offsets = [0, 64], sizes = [2, 32], strides = [1, 1]} : vector<2x128xf32> to vector<2x32xf32>
    %143 = vector.extract_strided_slice %139 {offsets = [0, 96], sizes = [2, 32], strides = [1, 1]} : vector<2x128xf32> to vector<2x32xf32>
    %144 = arith.mulf %141, %125 : vector<2x32xf32>
    %145 = arith.mulf %140, %142 : vector<2x32xf32>
    %146 = arith.addf %144, %145 : vector<2x32xf32>
    %147 = math.tanh %146 : vector<2x32xf32>
    %148 = arith.mulf %143, %147 : vector<2x32xf32>
    %c10_43 = arith.constant 10 : index
    %c0_44 = arith.constant 0 : index
    %149 = vector.load %arg15[%c10_43, %c0_44] : memref<16x32xf32, #tpu.memory_space<vmem>>, vector<2x32xf32>
    tpu.vector_store %arg15[%c10_43, %c0_44], %148 {strides = array<i32>} : memref<16x32xf32, #tpu.memory_space<vmem>>, vector<2x32xf32>,
    %c12 = arith.constant 12 : index
    %c0_45 = arith.constant 0 : index
    %150 = vector.load %arg14[%c12, %c0_45] : memref<16x128xf32, #tpu.memory_space<vmem>>, vector<2x128xf32>
    %151 = arith.truncf %148 : vector<2x32xf32> to vector<2x32xbf16>
    %cst_46 = arith.constant dense<0.000000e+00> : vector<2x128xf32>
    %152 = tpu.matmul %151, %21, %cst_46 {dimension_numbers = #tpu.dot_dimension_numbers<[1], [0], [0], [1], [0, 0, 1, 1], [], []>} : vector<2x32xbf16>, vector<32x128xbf16>, vector<2x128xf32> -> vector<2x128xf32>
    %153 = arith.addf %150, %152 : vector<2x128xf32>
    %154 = arith.negf %153 : vector<2x128xf32>
    %155 = math.exp %154 : vector<2x128xf32>
    %cst_47 = arith.constant 1.000000e+00 : f32
    %156 = vector.broadcast %cst_47 : f32 to vector<2x128xf32>
    %157 = arith.addf %156, %155 : vector<2x128xf32>
    %158 = arith.divf %156, %157 : vector<2x128xf32>
    %159 = math.tanh %153 : vector<2x128xf32>
    %160 = arith.select %13, %159, %158 : vector<2x128xi1>, vector<2x128xf32>
    %161 = vector.extract_strided_slice %160 {offsets = [0, 0], sizes = [2, 32], strides = [1, 1]} : vector<2x128xf32> to vector<2x32xf32>
    %162 = vector.extract_strided_slice %160 {offsets = [0, 32], sizes = [2, 32], strides = [1, 1]} : vector<2x128xf32> to vector<2x32xf32>
    %163 = vector.extract_strided_slice %160 {offsets = [0, 64], sizes = [2, 32], strides = [1, 1]} : vector<2x128xf32> to vector<2x32xf32>
    %164 = vector.extract_strided_slice %160 {offsets = [0, 96], sizes = [2, 32], strides = [1, 1]} : vector<2x128xf32> to vector<2x32xf32>
    %165 = arith.mulf %162, %146 : vector<2x32xf32>
    %166 = arith.mulf %161, %163 : vector<2x32xf32>
    %167 = arith.addf %165, %166 : vector<2x32xf32>
    %168 = math.tanh %167 : vector<2x32xf32>
    %169 = arith.mulf %164, %168 : vector<2x32xf32>
    %c12_48 = arith.constant 12 : index
    %c0_49 = arith.constant 0 : index
    %170 = vector.load %arg15[%c12_48, %c0_49] : memref<16x32xf32, #tpu.memory_space<vmem>>, vector<2x32xf32>
    tpu.vector_store %arg15[%c12_48, %c0_49], %169 {strides = array<i32>} : memref<16x32xf32, #tpu.memory_space<vmem>>, vector<2x32xf32>,
    %c14 = arith.constant 14 : index
    %c0_50 = arith.constant 0 : index
    %171 = vector.load %arg14[%c14, %c0_50] : memref<16x128xf32, #tpu.memory_space<vmem>>, vector<2x128xf32>
    %172 = arith.truncf %169 : vector<2x32xf32> to vector<2x32xbf16>
    %cst_51 = arith.constant dense<0.000000e+00> : vector<2x128xf32>
    %173 = tpu.matmul %172, %21, %cst_51 {dimension_numbers = #tpu.dot_dimension_numbers<[1], [0], [0], [1], [0, 0, 1, 1], [], []>} : vector<2x32xbf16>, vector<32x128xbf16>, vector<2x128xf32> -> vector<2x128xf32>
    %174 = arith.addf %171, %173 : vector<2x128xf32>
    %175 = arith.negf %174 : vector<2x128xf32>
    %176 = math.exp %175 : vector<2x128xf32>
    %cst_52 = arith.constant 1.000000e+00 : f32
    %177 = vector.broadcast %cst_52 : f32 to vector<2x128xf32>
    %178 = arith.addf %177, %176 : vector<2x128xf32>
    %179 = arith.divf %177, %178 : vector<2x128xf32>
    %180 = math.tanh %174 : vector<2x128xf32>
    %181 = arith.select %13, %180, %179 : vector<2x128xi1>, vector<2x128xf32>
    %182 = vector.extract_strided_slice %181 {offsets = [0, 0], sizes = [2, 32], strides = [1, 1]} : vector<2x128xf32> to vector<2x32xf32>
    %183 = vector.extract_strided_slice %181 {offsets = [0, 32], sizes = [2, 32], strides = [1, 1]} : vector<2x128xf32> to vector<2x32xf32>
    %184 = vector.extract_strided_slice %181 {offsets = [0, 64], sizes = [2, 32], strides = [1, 1]} : vector<2x128xf32> to vector<2x32xf32>
    %185 = vector.extract_strided_slice %181 {offsets = [0, 96], sizes = [2, 32], strides = [1, 1]} : vector<2x128xf32> to vector<2x32xf32>
    %186 = arith.mulf %183, %167 : vector<2x32xf32>
    %187 = arith.mulf %182, %184 : vector<2x32xf32>
    %188 = arith.addf %186, %187 : vector<2x32xf32>
    %189 = math.tanh %188 : vector<2x32xf32>
    %190 = arith.mulf %185, %189 : vector<2x32xf32>
    %c14_53 = arith.constant 14 : index
    %c0_54 = arith.constant 0 : index
    %191 = vector.load %arg15[%c14_53, %c0_54] : memref<16x32xf32, #tpu.memory_space<vmem>>, vector<2x32xf32>
    tpu.vector_store %arg15[%c14_53, %c0_54], %190 {strides = array<i32>} : memref<16x32xf32, #tpu.memory_space<vmem>>, vector<2x32xf32>,
    %c0_55 = arith.constant 0 : index
    %c0_56 = arith.constant 0 : index
    %192 = vector.load %arg15[%c0_55, %c0_56] : memref<16x32xf32, #tpu.memory_space<vmem>>, vector<16x32xf32>
    %c0_57 = arith.constant 0 : index
    %c0_58 = arith.constant 0 : index
    %c0_59 = arith.constant 0 : index
    %193 = vector.load %arg12[%c0_57, %c0_58, %c0_59] : memref<2x2x32xf32, #tpu.memory_space<vmem>>, vector<1x2x32xf32>
    %194 = vector.shape_cast %193 : vector<1x2x32xf32> to vector<2x32xf32>
    %195 = vector.shape_cast %190 : vector<2x32xf32> to vector<1x2x32xf32>
    tpu.vector_store %arg12[%c0_57, %c0_58, %c0_59], %195 {strides = array<i32>} : memref<2x2x32xf32, #tpu.memory_space<vmem>>, vector<1x2x32xf32>,
    %c0_60 = arith.constant 0 : index
    %c0_61 = arith.constant 0 : index
    %c0_62 = arith.constant 0 : index
    %196 = vector.load %arg13[%c0_60, %c0_61, %c0_62] : memref<2x2x32xf32, #tpu.memory_space<vmem>>, vector<1x2x32xf32>
    %197 = vector.shape_cast %196 : vector<1x2x32xf32> to vector<2x32xf32>
    %198 = vector.shape_cast %188 : vector<2x32xf32> to vector<1x2x32xf32>
    tpu.vector_store %arg13[%c0_60, %c0_61, %c0_62], %198 {strides = array<i32>} : memref<2x2x32xf32, #tpu.memory_space<vmem>>, vector<1x2x32xf32>,
    %199 = arith.truncf %192 : vector<16x32xf32> to vector<16x32xbf16>
    %c0_63 = arith.constant 0 : index
    %c0_64 = arith.constant 0 : index
    %200 = vector.load %arg6[%c0_63, %c0_64] : memref<32x128xbf16, #tpu.memory_space<vmem>>, vector<32x128xbf16>
    %cst_65 = arith.constant dense<0.000000e+00> : vector<16x128xf32>
    %201 = tpu.matmul %199, %200, %cst_65 {dimension_numbers = #tpu.dot_dimension_numbers<[1], [0], [0], [1], [0, 0, 1, 1], [], []>} : vector<16x32xbf16>, vector<32x128xbf16>, vector<16x128xf32> -> vector<16x128xf32>
    %c0_66 = arith.constant 0 : index
    %c0_67 = arith.constant 0 : index
    %202 = vector.load %arg8[%c0_66, %c0_67] : memref<1x128xf32, #tpu.memory_space<vmem>>, vector<1x128xf32>
    %203 = vector.broadcast %202 : vector<1x128xf32> to vector<16x128xf32>
    %204 = arith.addf %201, %203 : vector<16x128xf32>
    %c0_68 = arith.constant 0 : index
    %c0_69 = arith.constant 0 : index
    %205 = vector.load %arg14[%c0_68, %c0_69] : memref<16x128xf32, #tpu.memory_space<vmem>>, vector<16x128xf32>
    tpu.vector_store %arg14[%c0_68, %c0_69], %204 {strides = array<i32>} : memref<16x128xf32, #tpu.memory_space<vmem>>, vector<16x128xf32>,
    %c0_70 = arith.constant 0 : index
    %c0_71 = arith.constant 0 : index
    %206 = vector.load %arg7[%c0_70, %c0_71] : memref<32x128xbf16, #tpu.memory_space<vmem>>, vector<32x128xbf16>
    %cst_72 = arith.constant 0.000000e+00 : f32
    %207 = vector.broadcast %cst_72 : f32 to vector<2x32xf32>
    %cst_73 = arith.constant 0.000000e+00 : f32
    %208 = vector.broadcast %cst_73 : f32 to vector<2x32xf32>
    %c0_74 = arith.constant 0 : index
    %c0_75 = arith.constant 0 : index
    %209 = vector.load %arg14[%c0_74, %c0_75] : memref<16x128xf32, #tpu.memory_space<vmem>>, vector<2x128xf32>
    %210 = arith.truncf %207 : vector<2x32xf32> to vector<2x32xbf16>
    %cst_76 = arith.constant dense<0.000000e+00> : vector<2x128xf32>
    %211 = tpu.matmul %210, %206, %cst_76 {dimension_numbers = #tpu.dot_dimension_numbers<[1], [0], [0], [1], [0, 0, 1, 1], [], []>} : vector<2x32xbf16>, vector<32x128xbf16>, vector<2x128xf32> -> vector<2x128xf32>
    %212 = arith.addf %209, %211 : vector<2x128xf32>
    %213 = arith.negf %212 : vector<2x128xf32>
    %214 = math.exp %213 : vector<2x128xf32>
    %cst_77 = arith.constant 1.000000e+00 : f32
    %215 = vector.broadcast %cst_77 : f32 to vector<2x128xf32>
    %216 = arith.addf %215, %214 : vector<2x128xf32>
    %217 = arith.divf %215, %216 : vector<2x128xf32>
    %218 = math.tanh %212 : vector<2x128xf32>
    %219 = arith.select %13, %218, %217 : vector<2x128xi1>, vector<2x128xf32>
    %220 = vector.extract_strided_slice %219 {offsets = [0, 0], sizes = [2, 32], strides = [1, 1]} : vector<2x128xf32> to vector<2x32xf32>
    %221 = vector.extract_strided_slice %219 {offsets = [0, 32], sizes = [2, 32], strides = [1, 1]} : vector<2x128xf32> to vector<2x32xf32>
    %222 = vector.extract_strided_slice %219 {offsets = [0, 64], sizes = [2, 32], strides = [1, 1]} : vector<2x128xf32> to vector<2x32xf32>
    %223 = vector.extract_strided_slice %219 {offsets = [0, 96], sizes = [2, 32], strides = [1, 1]} : vector<2x128xf32> to vector<2x32xf32>
    %224 = arith.mulf %221, %208 : vector<2x32xf32>
    %225 = arith.mulf %220, %222 : vector<2x32xf32>
    %226 = arith.addf %224, %225 : vector<2x32xf32>
    %227 = math.tanh %226 : vector<2x32xf32>
    %228 = arith.mulf %223, %227 : vector<2x32xf32>
    %c2_78 = arith.constant 2 : index
    %c0_79 = arith.constant 0 : index
    %229 = vector.load %arg14[%c2_78, %c0_79] : memref<16x128xf32, #tpu.memory_space<vmem>>, vector<2x128xf32>
    %230 = arith.truncf %228 : vector<2x32xf32> to vector<2x32xbf16>
    %cst_80 = arith.constant dense<0.000000e+00> : vector<2x128xf32>
    %231 = tpu.matmul %230, %206, %cst_80 {dimension_numbers = #tpu.dot_dimension_numbers<[1], [0], [0], [1], [0, 0, 1, 1], [], []>} : vector<2x32xbf16>, vector<32x128xbf16>, vector<2x128xf32> -> vector<2x128xf32>
    %232 = arith.addf %229, %231 : vector<2x128xf32>
    %233 = arith.negf %232 : vector<2x128xf32>
    %234 = math.exp %233 : vector<2x128xf32>
    %cst_81 = arith.constant 1.000000e+00 : f32
    %235 = vector.broadcast %cst_81 : f32 to vector<2x128xf32>
    %236 = arith.addf %235, %234 : vector<2x128xf32>
    %237 = arith.divf %235, %236 : vector<2x128xf32>
    %238 = math.tanh %232 : vector<2x128xf32>
    %239 = arith.select %13, %238, %237 : vector<2x128xi1>, vector<2x128xf32>
    %240 = vector.extract_strided_slice %239 {offsets = [0, 0], sizes = [2, 32], strides = [1, 1]} : vector<2x128xf32> to vector<2x32xf32>
    %241 = vector.extract_strided_slice %239 {offsets = [0, 32], sizes = [2, 32], strides = [1, 1]} : vector<2x128xf32> to vector<2x32xf32>
    %242 = vector.extract_strided_slice %239 {offsets = [0, 64], sizes = [2, 32], strides = [1, 1]} : vector<2x128xf32> to vector<2x32xf32>
    %243 = vector.extract_strided_slice %239 {offsets = [0, 96], sizes = [2, 32], strides = [1, 1]} : vector<2x128xf32> to vector<2x32xf32>
    %244 = arith.mulf %241, %226 : vector<2x32xf32>
    %245 = arith.mulf %240, %242 : vector<2x32xf32>
    %246 = arith.addf %244, %245 : vector<2x32xf32>
    %247 = math.tanh %246 : vector<2x32xf32>
    %248 = arith.mulf %243, %247 : vector<2x32xf32>
    %c4_82 = arith.constant 4 : index
    %c0_83 = arith.constant 0 : index
    %249 = vector.load %arg14[%c4_82, %c0_83] : memref<16x128xf32, #tpu.memory_space<vmem>>, vector<2x128xf32>
    %250 = arith.truncf %248 : vector<2x32xf32> to vector<2x32xbf16>
    %cst_84 = arith.constant dense<0.000000e+00> : vector<2x128xf32>
    %251 = tpu.matmul %250, %206, %cst_84 {dimension_numbers = #tpu.dot_dimension_numbers<[1], [0], [0], [1], [0, 0, 1, 1], [], []>} : vector<2x32xbf16>, vector<32x128xbf16>, vector<2x128xf32> -> vector<2x128xf32>
    %252 = arith.addf %249, %251 : vector<2x128xf32>
    %253 = arith.negf %252 : vector<2x128xf32>
    %254 = math.exp %253 : vector<2x128xf32>
    %cst_85 = arith.constant 1.000000e+00 : f32
    %255 = vector.broadcast %cst_85 : f32 to vector<2x128xf32>
    %256 = arith.addf %255, %254 : vector<2x128xf32>
    %257 = arith.divf %255, %256 : vector<2x128xf32>
    %258 = math.tanh %252 : vector<2x128xf32>
    %259 = arith.select %13, %258, %257 : vector<2x128xi1>, vector<2x128xf32>
    %260 = vector.extract_strided_slice %259 {offsets = [0, 0], sizes = [2, 32], strides = [1, 1]} : vector<2x128xf32> to vector<2x32xf32>
    %261 = vector.extract_strided_slice %259 {offsets = [0, 32], sizes = [2, 32], strides = [1, 1]} : vector<2x128xf32> to vector<2x32xf32>
    %262 = vector.extract_strided_slice %259 {offsets = [0, 64], sizes = [2, 32], strides = [1, 1]} : vector<2x128xf32> to vector<2x32xf32>
    %263 = vector.extract_strided_slice %259 {offsets = [0, 96], sizes = [2, 32], strides = [1, 1]} : vector<2x128xf32> to vector<2x32xf32>
    %264 = arith.mulf %261, %246 : vector<2x32xf32>
    %265 = arith.mulf %260, %262 : vector<2x32xf32>
    %266 = arith.addf %264, %265 : vector<2x32xf32>
    %267 = math.tanh %266 : vector<2x32xf32>
    %268 = arith.mulf %263, %267 : vector<2x32xf32>
    %c6_86 = arith.constant 6 : index
    %c0_87 = arith.constant 0 : index
    %269 = vector.load %arg14[%c6_86, %c0_87] : memref<16x128xf32, #tpu.memory_space<vmem>>, vector<2x128xf32>
    %270 = arith.truncf %268 : vector<2x32xf32> to vector<2x32xbf16>
    %cst_88 = arith.constant dense<0.000000e+00> : vector<2x128xf32>
    %271 = tpu.matmul %270, %206, %cst_88 {dimension_numbers = #tpu.dot_dimension_numbers<[1], [0], [0], [1], [0, 0, 1, 1], [], []>} : vector<2x32xbf16>, vector<32x128xbf16>, vector<2x128xf32> -> vector<2x128xf32>
    %272 = arith.addf %269, %271 : vector<2x128xf32>
    %273 = arith.negf %272 : vector<2x128xf32>
    %274 = math.exp %273 : vector<2x128xf32>
    %cst_89 = arith.constant 1.000000e+00 : f32
    %275 = vector.broadcast %cst_89 : f32 to vector<2x128xf32>
    %276 = arith.addf %275, %274 : vector<2x128xf32>
    %277 = arith.divf %275, %276 : vector<2x128xf32>
    %278 = math.tanh %272 : vector<2x128xf32>
    %279 = arith.select %13, %278, %277 : vector<2x128xi1>, vector<2x128xf32>
    %280 = vector.extract_strided_slice %279 {offsets = [0, 0], sizes = [2, 32], strides = [1, 1]} : vector<2x128xf32> to vector<2x32xf32>
    %281 = vector.extract_strided_slice %279 {offsets = [0, 32], sizes = [2, 32], strides = [1, 1]} : vector<2x128xf32> to vector<2x32xf32>
    %282 = vector.extract_strided_slice %279 {offsets = [0, 64], sizes = [2, 32], strides = [1, 1]} : vector<2x128xf32> to vector<2x32xf32>
    %283 = vector.extract_strided_slice %279 {offsets = [0, 96], sizes = [2, 32], strides = [1, 1]} : vector<2x128xf32> to vector<2x32xf32>
    %284 = arith.mulf %281, %266 : vector<2x32xf32>
    %285 = arith.mulf %280, %282 : vector<2x32xf32>
    %286 = arith.addf %284, %285 : vector<2x32xf32>
    %287 = math.tanh %286 : vector<2x32xf32>
    %288 = arith.mulf %283, %287 : vector<2x32xf32>
    %c8_90 = arith.constant 8 : index
    %c0_91 = arith.constant 0 : index
    %289 = vector.load %arg14[%c8_90, %c0_91] : memref<16x128xf32, #tpu.memory_space<vmem>>, vector<2x128xf32>
    %290 = arith.truncf %288 : vector<2x32xf32> to vector<2x32xbf16>
    %cst_92 = arith.constant dense<0.000000e+00> : vector<2x128xf32>
    %291 = tpu.matmul %290, %206, %cst_92 {dimension_numbers = #tpu.dot_dimension_numbers<[1], [0], [0], [1], [0, 0, 1, 1], [], []>} : vector<2x32xbf16>, vector<32x128xbf16>, vector<2x128xf32> -> vector<2x128xf32>
    %292 = arith.addf %289, %291 : vector<2x128xf32>
    %293 = arith.negf %292 : vector<2x128xf32>
    %294 = math.exp %293 : vector<2x128xf32>
    %cst_93 = arith.constant 1.000000e+00 : f32
    %295 = vector.broadcast %cst_93 : f32 to vector<2x128xf32>
    %296 = arith.addf %295, %294 : vector<2x128xf32>
    %297 = arith.divf %295, %296 : vector<2x128xf32>
    %298 = math.tanh %292 : vector<2x128xf32>
    %299 = arith.select %13, %298, %297 : vector<2x128xi1>, vector<2x128xf32>
    %300 = vector.extract_strided_slice %299 {offsets = [0, 0], sizes = [2, 32], strides = [1, 1]} : vector<2x128xf32> to vector<2x32xf32>
    %301 = vector.extract_strided_slice %299 {offsets = [0, 32], sizes = [2, 32], strides = [1, 1]} : vector<2x128xf32> to vector<2x32xf32>
    %302 = vector.extract_strided_slice %299 {offsets = [0, 64], sizes = [2, 32], strides = [1, 1]} : vector<2x128xf32> to vector<2x32xf32>
    %303 = vector.extract_strided_slice %299 {offsets = [0, 96], sizes = [2, 32], strides = [1, 1]} : vector<2x128xf32> to vector<2x32xf32>
    %304 = arith.mulf %301, %286 : vector<2x32xf32>
    %305 = arith.mulf %300, %302 : vector<2x32xf32>
    %306 = arith.addf %304, %305 : vector<2x32xf32>
    %307 = math.tanh %306 : vector<2x32xf32>
    %308 = arith.mulf %303, %307 : vector<2x32xf32>
    %c10_94 = arith.constant 10 : index
    %c0_95 = arith.constant 0 : index
    %309 = vector.load %arg14[%c10_94, %c0_95] : memref<16x128xf32, #tpu.memory_space<vmem>>, vector<2x128xf32>
    %310 = arith.truncf %308 : vector<2x32xf32> to vector<2x32xbf16>
    %cst_96 = arith.constant dense<0.000000e+00> : vector<2x128xf32>
    %311 = tpu.matmul %310, %206, %cst_96 {dimension_numbers = #tpu.dot_dimension_numbers<[1], [0], [0], [1], [0, 0, 1, 1], [], []>} : vector<2x32xbf16>, vector<32x128xbf16>, vector<2x128xf32> -> vector<2x128xf32>
    %312 = arith.addf %309, %311 : vector<2x128xf32>
    %313 = arith.negf %312 : vector<2x128xf32>
    %314 = math.exp %313 : vector<2x128xf32>
    %cst_97 = arith.constant 1.000000e+00 : f32
    %315 = vector.broadcast %cst_97 : f32 to vector<2x128xf32>
    %316 = arith.addf %315, %314 : vector<2x128xf32>
    %317 = arith.divf %315, %316 : vector<2x128xf32>
    %318 = math.tanh %312 : vector<2x128xf32>
    %319 = arith.select %13, %318, %317 : vector<2x128xi1>, vector<2x128xf32>
    %320 = vector.extract_strided_slice %319 {offsets = [0, 0], sizes = [2, 32], strides = [1, 1]} : vector<2x128xf32> to vector<2x32xf32>
    %321 = vector.extract_strided_slice %319 {offsets = [0, 32], sizes = [2, 32], strides = [1, 1]} : vector<2x128xf32> to vector<2x32xf32>
    %322 = vector.extract_strided_slice %319 {offsets = [0, 64], sizes = [2, 32], strides = [1, 1]} : vector<2x128xf32> to vector<2x32xf32>
    %323 = vector.extract_strided_slice %319 {offsets = [0, 96], sizes = [2, 32], strides = [1, 1]} : vector<2x128xf32> to vector<2x32xf32>
    %324 = arith.mulf %321, %306 : vector<2x32xf32>
    %325 = arith.mulf %320, %322 : vector<2x32xf32>
    %326 = arith.addf %324, %325 : vector<2x32xf32>
    %327 = math.tanh %326 : vector<2x32xf32>
    %328 = arith.mulf %323, %327 : vector<2x32xf32>
    %c12_98 = arith.constant 12 : index
    %c0_99 = arith.constant 0 : index
    %329 = vector.load %arg14[%c12_98, %c0_99] : memref<16x128xf32, #tpu.memory_space<vmem>>, vector<2x128xf32>
    %330 = arith.truncf %328 : vector<2x32xf32> to vector<2x32xbf16>
    %cst_100 = arith.constant dense<0.000000e+00> : vector<2x128xf32>
    %331 = tpu.matmul %330, %206, %cst_100 {dimension_numbers = #tpu.dot_dimension_numbers<[1], [0], [0], [1], [0, 0, 1, 1], [], []>} : vector<2x32xbf16>, vector<32x128xbf16>, vector<2x128xf32> -> vector<2x128xf32>
    %332 = arith.addf %329, %331 : vector<2x128xf32>
    %333 = arith.negf %332 : vector<2x128xf32>
    %334 = math.exp %333 : vector<2x128xf32>
    %cst_101 = arith.constant 1.000000e+00 : f32
    %335 = vector.broadcast %cst_101 : f32 to vector<2x128xf32>
    %336 = arith.addf %335, %334 : vector<2x128xf32>
    %337 = arith.divf %335, %336 : vector<2x128xf32>
    %338 = math.tanh %332 : vector<2x128xf32>
    %339 = arith.select %13, %338, %337 : vector<2x128xi1>, vector<2x128xf32>
    %340 = vector.extract_strided_slice %339 {offsets = [0, 0], sizes = [2, 32], strides = [1, 1]} : vector<2x128xf32> to vector<2x32xf32>
    %341 = vector.extract_strided_slice %339 {offsets = [0, 32], sizes = [2, 32], strides = [1, 1]} : vector<2x128xf32> to vector<2x32xf32>
    %342 = vector.extract_strided_slice %339 {offsets = [0, 64], sizes = [2, 32], strides = [1, 1]} : vector<2x128xf32> to vector<2x32xf32>
    %343 = vector.extract_strided_slice %339 {offsets = [0, 96], sizes = [2, 32], strides = [1, 1]} : vector<2x128xf32> to vector<2x32xf32>
    %344 = arith.mulf %341, %326 : vector<2x32xf32>
    %345 = arith.mulf %340, %342 : vector<2x32xf32>
    %346 = arith.addf %344, %345 : vector<2x32xf32>
    %347 = math.tanh %346 : vector<2x32xf32>
    %348 = arith.mulf %343, %347 : vector<2x32xf32>
    %c14_102 = arith.constant 14 : index
    %c0_103 = arith.constant 0 : index
    %349 = vector.load %arg14[%c14_102, %c0_103] : memref<16x128xf32, #tpu.memory_space<vmem>>, vector<2x128xf32>
    %350 = arith.truncf %348 : vector<2x32xf32> to vector<2x32xbf16>
    %cst_104 = arith.constant dense<0.000000e+00> : vector<2x128xf32>
    %351 = tpu.matmul %350, %206, %cst_104 {dimension_numbers = #tpu.dot_dimension_numbers<[1], [0], [0], [1], [0, 0, 1, 1], [], []>} : vector<2x32xbf16>, vector<32x128xbf16>, vector<2x128xf32> -> vector<2x128xf32>
    %352 = arith.addf %349, %351 : vector<2x128xf32>
    %353 = arith.negf %352 : vector<2x128xf32>
    %354 = math.exp %353 : vector<2x128xf32>
    %cst_105 = arith.constant 1.000000e+00 : f32
    %355 = vector.broadcast %cst_105 : f32 to vector<2x128xf32>
    %356 = arith.addf %355, %354 : vector<2x128xf32>
    %357 = arith.divf %355, %356 : vector<2x128xf32>
    %358 = math.tanh %352 : vector<2x128xf32>
    %359 = arith.select %13, %358, %357 : vector<2x128xi1>, vector<2x128xf32>
    %360 = vector.extract_strided_slice %359 {offsets = [0, 0], sizes = [2, 32], strides = [1, 1]} : vector<2x128xf32> to vector<2x32xf32>
    %361 = vector.extract_strided_slice %359 {offsets = [0, 32], sizes = [2, 32], strides = [1, 1]} : vector<2x128xf32> to vector<2x32xf32>
    %362 = vector.extract_strided_slice %359 {offsets = [0, 64], sizes = [2, 32], strides = [1, 1]} : vector<2x128xf32> to vector<2x32xf32>
    %363 = vector.extract_strided_slice %359 {offsets = [0, 96], sizes = [2, 32], strides = [1, 1]} : vector<2x128xf32> to vector<2x32xf32>
    %364 = arith.mulf %361, %346 : vector<2x32xf32>
    %365 = arith.mulf %360, %362 : vector<2x32xf32>
    %366 = arith.addf %364, %365 : vector<2x32xf32>
    %367 = math.tanh %366 : vector<2x32xf32>
    %368 = arith.mulf %363, %367 : vector<2x32xf32>
    %c1 = arith.constant 1 : index
    %c0_106 = arith.constant 0 : index
    %c0_107 = arith.constant 0 : index
    %369 = vector.load %arg12[%c1, %c0_106, %c0_107] : memref<2x2x32xf32, #tpu.memory_space<vmem>>, vector<1x2x32xf32>
    %370 = vector.shape_cast %369 : vector<1x2x32xf32> to vector<2x32xf32>
    %371 = vector.shape_cast %368 : vector<2x32xf32> to vector<1x2x32xf32>
    tpu.vector_store %arg12[%c1, %c0_106, %c0_107], %371 {strides = array<i32>} : memref<2x2x32xf32, #tpu.memory_space<vmem>>, vector<1x2x32xf32>,
    %c1_108 = arith.constant 1 : index
    %c0_109 = arith.constant 0 : index
    %c0_110 = arith.constant 0 : index
    %372 = vector.load %arg13[%c1_108, %c0_109, %c0_110] : memref<2x2x32xf32, #tpu.memory_space<vmem>>, vector<1x2x32xf32>
    %373 = vector.shape_cast %372 : vector<1x2x32xf32> to vector<2x32xf32>
    %374 = vector.shape_cast %366 : vector<2x32xf32> to vector<1x2x32xf32>
    tpu.vector_store %arg13[%c1_108, %c0_109, %c0_110], %374 {strides = array<i32>} : memref<2x2x32xf32, #tpu.memory_space<vmem>>, vector<1x2x32xf32>,
    %375 = arith.truncf %368 : vector<2x32xf32> to vector<2x32xbf16>
    %c0_111 = arith.constant 0 : index
    %c0_112 = arith.constant 0 : index
    %376 = vector.load %arg9[%c0_111, %c0_112] : memref<32x128xbf16, #tpu.memory_space<vmem>>, vector<32x128xbf16>
    %cst_113 = arith.constant dense<0.000000e+00> : vector<2x128xf32>
    %377 = tpu.matmul %375, %376, %cst_113 {dimension_numbers = #tpu.dot_dimension_numbers<[1], [0], [0], [1], [0, 0, 1, 1], [], []>} : vector<2x32xbf16>, vector<32x128xbf16>, vector<2x128xf32> -> vector<2x128xf32>
    %c0_114 = arith.constant 0 : index
    %c0_115 = arith.constant 0 : index
    %378 = vector.load %arg10[%c0_114, %c0_115] : memref<1x128xf32, #tpu.memory_space<vmem>>, vector<1x128xf32>
    %379 = vector.broadcast %378 : vector<1x128xf32> to vector<2x128xf32>
    %380 = arith.addf %377, %379 : vector<2x128xf32>
    %c0_116 = arith.constant 0 : index
    %c0_117 = arith.constant 0 : index
    %381 = vector.load %arg11[%c0_116, %c0_117] : memref<2x128xf32, #tpu.memory_space<vmem>>, vector<2x128xf32>
    tpu.vector_store %arg11[%c0_116, %c0_117], %380 {strides = array<i32>} : memref<2x128xf32, #tpu.memory_space<vmem>>, vector<2x128xf32>,
    return
  }
  func.func @transform_0(%arg0: i32) -> (i32, i32) {
    %c0_i32 = arith.constant 0 : i32
    %c0_i32_0 = arith.constant 0 : i32
    %c0_i32_1 = arith.constant 0 : i32
    return %c0_i32, %c0_i32_0 : i32, i32
  }
  func.func @transform_1(%arg0: i32) -> (i32, i32) {
    %c0_i32 = arith.constant 0 : i32
    %c0_i32_0 = arith.constant 0 : i32
    %c0_i32_1 = arith.constant 0 : i32
    return %c0_i32, %c0_i32_0 : i32, i32
  }
  func.func @transform_2(%arg0: i32) -> (i32, i32) {
    %c0_i32 = arith.constant 0 : i32
    %c0_i32_0 = arith.constant 0 : i32
    %c0_i32_1 = arith.constant 0 : i32
    return %c0_i32, %c0_i32_0 : i32, i32
  }
  func.func @transform_3(%arg0: i32) -> (i32, i32) {
    %c0_i32 = arith.constant 0 : i32
    %c0_i32_0 = arith.constant 0 : i32
    %c0_i32_1 = arith.constant 0 : i32
    return %c0_i32, %c0_i32_0 : i32, i32
  }
  func.func @transform_4(%arg0: i32) -> (i32, i32) {
    %c0_i32 = arith.constant 0 : i32
    %c0_i32_0 = arith.constant 0 : i32
    %c0_i32_1 = arith.constant 0 : i32
    return %c0_i32, %c0_i32_0 : i32, i32
  }
  func.func @transform_5(%arg0: i32) -> (i32, i32) {
    %c0_i32 = arith.constant 0 : i32
    %c0_i32_0 = arith.constant 0 : i32
    %c0_i32_1 = arith.constant 0 : i32
    return %c0_i32, %c0_i32_0 : i32, i32
  }
  func.func @transform_6(%arg0: i32) -> (i32, i32) {
    %c0_i32 = arith.constant 0 : i32
    %c0_i32_0 = arith.constant 0 : i32
    %c0_i32_1 = arith.constant 0 : i32
    return %c0_i32, %c0_i32_0 : i32, i32
  }
  func.func @transform_7(%arg0: i32) -> (i32, i32) {
    %c0_i32 = arith.constant 0 : i32
    %c0_i32_0 = arith.constant 0 : i32
    %c0_i32_1 = arith.constant 0 : i32
    return %c0_i32, %c0_i32_0 : i32, i32
  }
  func.func @transform_8(%arg0: i32) -> (i32, i32) {
    %c0_i32 = arith.constant 0 : i32
    %c0_i32_0 = arith.constant 0 : i32
    %c0_i32_1 = arith.constant 0 : i32
    return %c0_i32, %c0_i32_0 : i32, i32
  }
  func.func @transform_9(%arg0: i32) -> (i32, i32) {
    %c0_i32 = arith.constant 0 : i32
    %c0_i32_0 = arith.constant 0 : i32
    %c0_i32_1 = arith.constant 0 : i32
    return %c0_i32, %c0_i32_0 : i32, i32
  }
  func.func @transform_10(%arg0: i32) -> (i32, i32) {
    %c0_i32 = arith.constant 0 : i32
    %c0_i32_0 = arith.constant 0 : i32
    %c0_i32_1 = arith.constant 0 : i32
    return %c0_i32, %c0_i32_0 : i32, i32
  }
  func.func @transform_11(%arg0: i32) -> (i32, i32, i32) {
    %c0_i32 = arith.constant 0 : i32
    %c0_i32_0 = arith.constant 0 : i32
    %c0_i32_1 = arith.constant 0 : i32
    %c0_i32_2 = arith.constant 0 : i32
    return %c0_i32, %c0_i32_0, %c0_i32_1 : i32, i32, i32
  }
  func.func @transform_12(%arg0: i32) -> (i32, i32, i32) {
    %c0_i32 = arith.constant 0 : i32
    %c0_i32_0 = arith.constant 0 : i32
    %c0_i32_1 = arith.constant 0 : i32
    %c0_i32_2 = arith.constant 0 : i32
    return %c0_i32, %c0_i32_0, %c0_i32_1 : i32, i32, i32
  }
}

</mosaic_0001>

<bundles_post_ra>
// kernel: poetry_lstm_forward.1
= control target key start
LH: loop header
LB: loop body
LE: loop exit
PB: predicated region body
PF: predicated region fallthrough
CT: control target
= control target key end

     0   :  { %18 = vsyncpa [#allocation5], 0  ;;  %v1617_v2 = vmov 0   ;;  %s1953_s0 = inlined_call_operand.vmem [shape: s32[16,1], index: 0, kind: input, shape index: {}]   ;;  %s1954_s1 = inlined_call_operand.vmem [shape: f32[64,32], index: 1, kind: input, shape index: {}]   ;;  %s1955_s2 = inlined_call_operand.vmem [shape: bf16[32,128], index: 2, kind: input, shape index: {}]   ;;  %s1956_s3 = inlined_call_operand.vmem [shape: bf16[32,128], index: 3, kind: input, shape index: {}]   ;;  %s1957_s4 = inlined_call_operand.vmem [shape: f32[1,128], index: 4, kind: input, shape index: {}]   ;;  %s1958_s5 = inlined_call_operand.vmem [shape: bf16[32,128], index: 5, kind: input, shape index: {}]   ;;  %s1959_s6 = inlined_call_operand.vmem [shape: bf16[32,128], index: 6, kind: input, shape index: {}]   ;;  %s1960_s7 = inlined_call_operand.vmem [shape: f32[1,128], index: 7, kind: input, shape index: {}]   ;;  %s1961_s8 = inlined_call_operand.vmem [shape: bf16[32,128], index: 8, kind: input, shape index: {}]   ;;  %s1962_s9 = inlined_call_operand.vmem [shape: f32[1,128], index: 9, kind: input, shape index: {}]   ;;  %s1963_s10 = inlined_call_operand.hbm [shape: f32[2,128], index: 10, kind: output, shape index: {0}]   ;;  %s1964_s11 = inlined_call_operand.hbm [shape: f32[2,2,32], index: 11, kind: output, shape index: {1}]   ;;  %s1965_s12 = inlined_call_operand.hbm [shape: f32[2,2,32], index: 12, kind: output, shape index: {2}]  }
   0x1   :  { %v41_v0 = vld [vmem:[%s1953_s0] sm:$0xff]  ;;  %v64_v1 = vld [vmem:[%s1954_s1 + $0x38] sm:$0xff]  ;;  %1409 = vset.pattern.permute.xlu0 %v1617_v2  ;;  %v63_v3 = vld [vmem:[%s1954_s1 + $0x30] sm:$0xff] }
   0x2   :  { %80 = vmatpush.msra.mxu0 %v64_v1  ;;  %46 = vperm.xlu0 %1409, %v41_v0   ;;  %v62_v4 = vld [vmem:[%s1954_s1 + $0x28] sm:$0xff]  ;;  %v61_v5 = vld [vmem:[%s1954_s1 + $0x20] sm:$0xff] }
   0x4   :  { %81 = vmatpush.msra.mxu0 %v63_v3 }
   0x5   :  { %19 = vsyncpa [#allocation7], 0  ;;  %v60_v6 = vld [vmem:[%s1954_s1 + $0x18] sm:$0xff]  ;;  %v42_v7 = vld [vmem:[%s1953_s0 + $0x8] sm:$0xff]  ;;  %v43_v11 = vlaneseq  ;;  %vm65_vm0 = vcmask 523264   ;;  %v1618_v14 = vmov 0.0  }
   0x6   :  { %82 = vmatpush.msra.mxu0 %v62_v4  ;;  %v59_v8 = vld [vmem:[%s1954_s1 + $0x10] sm:$0xff]  ;;  %v58_v9 = vld [vmem:[%s1954_s1 + $0x8] sm:$0xff]  ;;  %v57_v10 = vld [vmem:[%s1954_s1] sm:$0xff]  ;;  %vm119_vm3 = vcmask 261120   ;;  %s1620_s29 = smov 32   ;;  %s1279_s1 = sshll.u32 %s1964_s11, 4  ;;  %s1280_s1 = int_to_ptr.hbm [resolvable:$true] %s1279_s1 }
   0x7   :  { %v1722_v12 = vand.u32 127, %v43_v11  ;;  %v1393_v18 = vld [vmem:[%s1956_s3 + $0x8] sm:$0xff]  ;;  %v1392_v20 = vld [vmem:[%s1956_s3] sm:$0xff]  ;;  %s1622_s24 = smov [#allocation6]   ;;  %s1623_s26 = smov 2  }
   0x8   :  { %83 = vmatpush.msra.mxu0 %v61_v5  ;;  %165 = vmatpush.bf16.msra.mxu2 %v1393_v18  ;;  %v1391_v19 = vld [vmem:[%s1955_s2 + $0x8] sm:$0xff]  ;;  %v1390_v21 = vld [vmem:[%s1955_s2] sm:$0xff]  ;;  %s1277_s25 = sshll.u32 %s1622_s24, 4  ;;  %s1624_s27 = smov [#allocation8]   ;;  %s1278_s25 = int_to_ptr.vmem [resolvable:$true] %s1277_s25 }
   0x9   :  { %231 = vmatpush.bf16.msra.mxu3 %v1393_v18  ;;  %129 = vmatpush.bf16.msra.mxu1 %v1391_v19  ;;  %v1410_v27 = vld [vmem:[%s1957_s4] ss:$0 sm:$0xff]  ;;  %vm95_vm4 = vcmp.ge.s32.totalorder %v1722_v12, 64  ;;  %vm96_vm5 = vcmp.lt.s32.totalorder %v1722_v12, 96  ;;  %s1619_s4 = smov 64   ;;  %v1399_v43 = vld [vmem:[%s1961_s8 + $0x8] sm:$0xff] }
   0xa   :  { %84 = vmatpush.msra.mxu0 %v60_v6  ;;  %49 = vperm.xlu0 %1409, %v42_v7   ;;  %vm1745_vm7 = vmand %vm95_vm4, %vm96_vm5  ;;  %s1290_s28 = sshll.u32 %s1624_s27, 4  ;;  %s1625_s13 = smov [#allocation4]   ;;  %s1291_s28 = int_to_ptr.vmem [resolvable:$true] %s1290_s28 }
   0xb   :  { %s1267_s14 = sshll.u32 %s1625_s13, 4  ;;  %s1269_s17 = sshll.u32 %s1963_s10, 4  ;;  %s1268_s14 = int_to_ptr.vmem [resolvable:$true] %s1267_s14  ;;  %s1270_s17 = int_to_ptr.hbm [resolvable:$true] %s1269_s17 }
   0xc   :  { %85 = vmatpush.msra.mxu0 %v59_v8  ;;  %166 = vmatpush.bf16.msra.mxu2 %v1392_v20 }
   0xd   :  { %232 = vmatpush.bf16.msra.mxu3 %v1392_v20  ;;  %130 = vmatpush.bf16.msra.mxu1 %v1390_v21 }
   0xe   :  { %86 = vmatpush.msra.mxu0 %v58_v9 }
   0xf   :  { %167 = vmatmul.bf16.vlgmr.msra.gmra.mxu2 %v1617_v2 }
  0x10   :  { %87 = vmatpush.msra.mxu0 %v57_v10  ;;  %361 = vmatpush.bf16.msrb.mxu2 %v1393_v18 }
  0x11   :  { %426 = vmatpush.bf16.msrb.mxu3 %v1393_v18  ;;  %296 = vmatpush.bf16.msrb.mxu1 %v1393_v18 }
  0x12   :  { %491 = vmatpush.bf16.msrb.mxu0 %v1393_v18 }
  0x14   :  { %362 = vmatpush.bf16.msrb.mxu2 %v1392_v20 }
  0x15   :  { %427 = vmatpush.bf16.msrb.mxu3 %v1392_v20  ;;  %297 = vmatpush.bf16.msrb.mxu1 %v1392_v20 }
  0x16   :  { %492 = vmatpush.bf16.msrb.mxu0 %v1392_v20 }
  0x18   :  { %621 = vmatpush.bf16.msra.mxu2 %v1393_v18 }
  0x1c   :  { %622 = vmatpush.bf16.msra.mxu2 %v1392_v20 }
  0x74   :  { %v47_v13 = vpop.permute.xlu0 %46 }
  0x75   :  { %vm51_vm1 = vcmp.eq.s32.totalorder %v47_v13, %v1722_v12 }
  0x76   :  { %v1313_v15 = vsel %vm51_vm1, 1.0, %v1618_v14 }
  0x77   :  { %1315 = vmatmul.msk.f32.vlgmr.msra.gmra.mxu0 %vm65_vm0, %v1313_v15 }
  0x7c   :  { %v50_v16 = vpop.permute.xlu0 %49 }
  0x7d   :  { %vm52_vm2 = vcmp.eq.s32.totalorder %v50_v16, %v1722_v12 }
  0x7e   :  { %v1314_v17 = vsel %vm52_vm2, 1.0, %v1618_v14 }
  0x7f   :  { %1316 = vmatmul.msk.f32.gmra.mxu0 %vm65_vm0, %v1314_v17 }
  0x92   :  { %v168_v25 = vpop.f32.mrf.mxu2 }
  0x9a   :  { %v170_v26 = vpop.f32.mrf.mxu2 }
  0xf4   :  { %v89_v22 = vpop.f32.mrf.mxu0 }
  0xfc   :  { %v92_v23 = vpop.f32.mrf.mxu0 }
  0xfd   :  { %v98_v24 = vpack.c.bf16 %v92_v23, %v89_v22 }
  0xff   :  { %1325 = vmatmul.msk.bf16.vlgmr.msra.gmra.mxu1 %vm119_vm3, %v98_v24 }
 0x100   :  { %556 = vmatpush.bf16.msra.mxu1 %v1393_v18 }
 0x104   :  { %557 = vmatpush.bf16.msra.mxu1 %v1392_v20 }
 0x17c   :  { %v132_v28 = vpop.f32.mrf.mxu1 }
 0x17d   :  { %v133_v29 = vadd.f32 %v1410_v27, %v132_v28 }
 0x17f   :  { %137 = vst [vmem:[#allocation2] sm:$0xff] %v133_v29 }
 0x184   :  { %v134_v30 = vpop.f32.mrf.mxu1 }
 0x185   :  { %v135_v31 = vadd.f32 %v1410_v27, %v134_v30 }
 0x186   :  { %v143_v32 = vld [vmem:[#allocation2] sm:$0x3]  ;;  %v217_v60 = vld [vmem:[#allocation2 + $0x2] sm:$0x3]  ;;  %v282_v26 = vld [vmem:[#allocation2 + $0x4] sm:$0x3] }
 0x187   :  { %v172_v33 = vadd.f32 %v168_v25, %v143_v32  ;;  %138 = vst [vmem:[#allocation2 + $0x8] sm:$0xff] %v135_v31 }
 0x189   :  { %v1334_v34 = vmul.f32 -1.442695, %v172_v33 }
 0x18b   :  { %1413 = vpow2.f32 %v1334_v34 }
 0x191   :  { %v1414_v35 = vpop.eup %1413 }
 0x192   :  { %v176_v36 = vadd.f32 1.0, %v1414_v35 }
 0x194   :  { %1415 = vrcp.f32 %v176_v36  ;;  %v188_v40 = vand.u32 2147483648, %v176_v36  ;;  %v186_v42 = vand.u32 2147483647, %v176_v36  ;;  %vm182_vm8 = vweird.f32 %v176_v36 }
 0x195   :  { %1417 = vtanh.f32 %v172_v33 }
 0x196   :  { %v189_v45 = vor.u32 1.1754944e-38, %v188_v40  ;;  %vm187_vm10 = vcmp.eq.f32.partialorder %v186_v42, 8.507059e+37 }
 0x19a   :  { %v1416_v37 = vpop.eup %1415 }
 0x19b   :  { %v178_v38 = vmul.f32 %v1416_v37, %v176_v36  ;;  %vm183_vm6 = vweird.f32 %v1416_v37  ;;  %v1418_v47 = vpop.eup %1417 }
 0x19c   :  { %vm184_vm9 = vmor %vm182_vm8, %vm183_vm6 }
 0x19d   :  { %v179_v39 = vsub.f32 1.0, %v178_v38 }
 0x19f   :  { %v180_v41 = vmul.f32 %v1416_v37, %v179_v39 }
 0x1a1   :  { %v181_v44 = vadd.f32 %v1416_v37, %v180_v41 }
 0x1a3   :  { %v185_v46 = vsel %vm184_vm9, %v1416_v37, %v181_v44 }
 0x1a4   :  { %v190_v48 = vsel %vm187_vm10, %v189_v45, %v185_v46 }
 0x1a5   :  { %v193_v49 = vsel %vm1745_vm7, %v1418_v47, %v190_v48 }
 0x1a6   :  { %196 = vrot.lane.b32.xlu1 %v193_v49, %s1619_s4  ;;  %v194_v52 = vmul.f32 0.0, %v193_v49 }
 0x218   :  { %v197_v50 = vpop.permute.xlu1 %196 }
 0x219   :  { %v199_v51 = vmul.f32 %v197_v50, %v193_v49 }
 0x21b   :  { %201 = vrot.lane.b32.xlu1 %v199_v51, %s1620_s29 }
 0x28d   :  { %v202_v53 = vpop.permute.xlu1 %201 }
 0x28e   :  { %v204_v54 = vadd.f32 %v202_v53, %v194_v52 }
 0x290   :  { %1419 = vtanh.f32 %v204_v54 }
 0x296   :  { %v1420_v55 = vpop.eup %1419 }
 0x297   :  { %207 = vrot.lane.b32.xlu2 %v1420_v55, %s1619_s4 }
 0x2f1   :  { %v208_v56 = vpop.permute.xlu2 %207 }
 0x2f2   :  { %v1754_v57 = vmul.f32 %v208_v56, %v193_v49  ;;  %v347_v56 = vld [vmem:[#allocation2 + $0x6] sm:$0x3] }
 0x2f4   :  { %v218_v58 = vpack.c.bf16 %v1754_v57, %v1754_v57 }
 0x2f6   :  { %220 = vrot.lane.b32.xlu2 %v218_v58, %s1620_s29 }
 0x350   :  { %v221_v59 = vpop.permute.xlu2 %220 }
 0x351   :  { %1335 = vmatmul.msk.bf16.vlgmr.msra.gmra.mxu3 %vm119_vm3, %v221_v59 }
 0x3d4   :  { %v234_v61 = vpop.f32.mrf.mxu3 }
 0x3d5   :  { %v238_v62 = vadd.f32 %v234_v61, %v217_v60 }
 0x3d7   :  { %v1336_v63 = vmul.f32 -1.442695, %v238_v62 }
 0x3d9   :  { %1421 = vpow2.f32 %v1336_v63 }
 0x3dc   :  { %v236_v0 = vpop.f32.mrf.mxu3 }
 0x3df   :  { %v1422_v1 = vpop.eup %1421 }
 0x3e0   :  { %v242_v3 = vadd.f32 1.0, %v1422_v1 }
 0x3e2   :  { %1423 = vrcp.f32 %v242_v3  ;;  %v254_v7 = vand.u32 2147483648, %v242_v3  ;;  %v252_v9 = vand.u32 2147483647, %v242_v3  ;;  %vm248_vm12 = vweird.f32 %v242_v3 }
 0x3e3   :  { %1425 = vtanh.f32 %v238_v62 }
 0x3e4   :  { %v255_v11 = vor.u32 1.1754944e-38, %v254_v7  ;;  %vm253_vm14 = vcmp.eq.f32.partialorder %v252_v9, 8.507059e+37 }
 0x3e8   :  { %v1424_v4 = vpop.eup %1423 }
 0x3e9   :  { %v244_v5 = vmul.f32 %v1424_v4, %v242_v3  ;;  %vm249_vm11 = vweird.f32 %v1424_v4  ;;  %v1426_v13 = vpop.eup %1425 }
 0x3ea   :  { %vm250_vm13 = vmor %vm248_vm12, %vm249_vm11 }
 0x3eb   :  { %v245_v6 = vsub.f32 1.0, %v244_v5 }
 0x3ed   :  { %v246_v8 = vmul.f32 %v1424_v4, %v245_v6 }
 0x3ef   :  { %v247_v10 = vadd.f32 %v1424_v4, %v246_v8 }
 0x3f1   :  { %v251_v12 = vsel %vm250_vm13, %v1424_v4, %v247_v10 }
 0x3f2   :  { %v256_v14 = vsel %vm253_vm14, %v255_v11, %v251_v12 }
 0x3f3   :  { %v259_v15 = vsel %vm1745_vm7, %v1426_v13, %v256_v14 }
 0x3f4   :  { %262 = vrot.lane.b32.xlu0 %v259_v15, %s1619_s4  ;;  %v260_v18 = vmul.f32 %v259_v15, %v204_v54 }
 0x466   :  { %v263_v16 = vpop.permute.xlu0 %262 }
 0x467   :  { %v265_v17 = vmul.f32 %v263_v16, %v259_v15 }
 0x469   :  { %267 = vrot.lane.b32.xlu1 %v265_v17, %s1620_s29 }
 0x4db   :  { %v268_v19 = vpop.permute.xlu1 %267 }
 0x4dc   :  { %v270_v20 = vadd.f32 %v268_v19, %v260_v18 }
 0x4de   :  { %1427 = vtanh.f32 %v270_v20 }
 0x4e4   :  { %v1428_v21 = vpop.eup %1427 }
 0x4e5   :  { %273 = vrot.lane.b32.xlu2 %v1428_v21, %s1619_s4 }
 0x53f   :  { %v274_v22 = vpop.permute.xlu2 %273 }
 0x540   :  { %v1765_v23 = vmul.f32 %v274_v22, %v259_v15 }
 0x542   :  { %v283_v24 = vpack.c.bf16 %v1765_v23, %v1765_v23 }
 0x544   :  { %285 = vrot.lane.b32.xlu0 %v283_v24, %s1620_s29  ;;  %v412_v24 = vld [vmem:[#allocation2 + $0x8] sm:$0x3] }
 0x5b6   :  { %v286_v25 = vpop.permute.xlu0 %285 }
 0x5b7   :  { %1337 = vmatmul.msk.bf16.vlgmr.msrb.gmra.mxu1 %vm119_vm3, %v286_v25 }
 0x634   :  { %v299_v27 = vpop.f32.mrf.mxu1 }
 0x635   :  { %v303_v28 = vadd.f32 %v299_v27, %v282_v26 }
 0x637   :  { %v1338_v29 = vmul.f32 -1.442695, %v303_v28 }
 0x639   :  { %1429 = vpow2.f32 %v1338_v29 }
 0x63c   :  { %v301_v30 = vpop.f32.mrf.mxu1 }
 0x63f   :  { %v1430_v31 = vpop.eup %1429 }
 0x640   :  { %v307_v32 = vadd.f32 1.0, %v1430_v31 }
 0x642   :  { %1431 = vrcp.f32 %v307_v32  ;;  %v319_v36 = vand.u32 2147483648, %v307_v32  ;;  %v317_v38 = vand.u32 2147483647, %v307_v32  ;;  %vm313_vm0 = vweird.f32 %v307_v32 }
 0x643   :  { %1433 = vtanh.f32 %v303_v28 }
 0x644   :  { %v320_v40 = vor.u32 1.1754944e-38, %v319_v36  ;;  %vm318_vm2 = vcmp.eq.f32.partialorder %v317_v38, 8.507059e+37 }
 0x648   :  { %v1432_v33 = vpop.eup %1431 }
 0x649   :  { %v309_v34 = vmul.f32 %v1432_v33, %v307_v32  ;;  %vm314_vm15 = vweird.f32 %v1432_v33  ;;  %v1434_v42 = vpop.eup %1433 }
 0x64a   :  { %vm315_vm1 = vmor %vm313_vm0, %vm314_vm15 }
 0x64b   :  { %v310_v35 = vsub.f32 1.0, %v309_v34 }
 0x64d   :  { %v311_v37 = vmul.f32 %v1432_v33, %v310_v35 }
 0x64f   :  { %v312_v39 = vadd.f32 %v1432_v33, %v311_v37 }
 0x651   :  { %v316_v41 = vsel %vm315_vm1, %v1432_v33, %v312_v39 }
 0x652   :  { %v321_v44 = vsel %vm318_vm2, %v320_v40, %v316_v41 }
 0x653   :  { %v324_v45 = vsel %vm1745_vm7, %v1434_v42, %v321_v44 }
 0x654   :  { %327 = vrot.lane.b32.xlu1 %v324_v45, %s1619_s4  ;;  %v325_v48 = vmul.f32 %v324_v45, %v270_v20 }
 0x6c6   :  { %v328_v46 = vpop.permute.xlu1 %327 }
 0x6c7   :  { %v330_v47 = vmul.f32 %v328_v46, %v324_v45 }
 0x6c9   :  { %332 = vrot.lane.b32.xlu2 %v330_v47, %s1620_s29 }
 0x723   :  { %v333_v49 = vpop.permute.xlu2 %332 }
 0x724   :  { %v335_v50 = vadd.f32 %v333_v49, %v325_v48 }
 0x726   :  { %1435 = vtanh.f32 %v335_v50 }
 0x72c   :  { %v1436_v51 = vpop.eup %1435 }
 0x72d   :  { %338 = vrot.lane.b32.xlu0 %v1436_v51, %s1619_s4 }
 0x79f   :  { %v339_v52 = vpop.permute.xlu0 %338 }
 0x7a0   :  { %v1776_v53 = vmul.f32 %v339_v52, %v324_v45 }
 0x7a2   :  { %v348_v54 = vpack.c.bf16 %v1776_v53, %v1776_v53 }
 0x7a4   :  { %350 = vrot.lane.b32.xlu1 %v348_v54, %s1620_s29 }
 0x816   :  { %v351_v55 = vpop.permute.xlu1 %350 }
 0x817   :  { %1339 = vmatmul.msk.bf16.vlgmr.msrb.gmra.mxu2 %vm119_vm3, %v351_v55  ;;  %v477_v55 = vld [vmem:[#allocation2 + $0xa] sm:$0x3] }
 0x89a   :  { %v364_v58 = vpop.f32.mrf.mxu2 }
 0x89b   :  { %v368_v59 = vadd.f32 %v364_v58, %v347_v56 }
 0x89d   :  { %v1340_v60 = vmul.f32 -1.442695, %v368_v59 }
 0x89f   :  { %1437 = vpow2.f32 %v1340_v60 }
 0x8a2   :  { %v366_v61 = vpop.f32.mrf.mxu2 }
 0x8a5   :  { %v1438_v62 = vpop.eup %1437 }
 0x8a6   :  { %v372_v63 = vadd.f32 1.0, %v1438_v62 }
 0x8a8   :  { %1439 = vrcp.f32 %v372_v63  ;;  %v384_v4 = vand.u32 2147483648, %v372_v63  ;;  %v382_v6 = vand.u32 2147483647, %v372_v63  ;;  %vm378_vm5 = vweird.f32 %v372_v63 }
 0x8a9   :  { %1441 = vtanh.f32 %v368_v59 }
 0x8aa   :  { %v385_v8 = vor.u32 1.1754944e-38, %v384_v4  ;;  %vm383_vm8 = vcmp.eq.f32.partialorder %v382_v6, 8.507059e+37 }
 0x8ae   :  { %v1440_v0 = vpop.eup %1439 }
 0x8af   :  { %v374_v1 = vmul.f32 %v1440_v0, %v372_v63  ;;  %vm379_vm4 = vweird.f32 %v1440_v0  ;;  %v1442_v10 = vpop.eup %1441 }
 0x8b0   :  { %vm380_vm6 = vmor %vm378_vm5, %vm379_vm4 }
 0x8b1   :  { %v375_v3 = vsub.f32 1.0, %v374_v1 }
 0x8b3   :  { %v376_v5 = vmul.f32 %v1440_v0, %v375_v3 }
 0x8b5   :  { %v377_v7 = vadd.f32 %v1440_v0, %v376_v5 }
 0x8b7   :  { %v381_v9 = vsel %vm380_vm6, %v1440_v0, %v377_v7 }
 0x8b8   :  { %v386_v11 = vsel %vm383_vm8, %v385_v8, %v381_v9 }
 0x8b9   :  { %v389_v12 = vsel %vm1745_vm7, %v1442_v10, %v386_v11 }
 0x8ba   :  { %392 = vrot.lane.b32.xlu2 %v389_v12, %s1619_s4  ;;  %v390_v15 = vmul.f32 %v389_v12, %v335_v50 }
 0x914   :  { %v393_v13 = vpop.permute.xlu2 %392 }
 0x915   :  { %v395_v14 = vmul.f32 %v393_v13, %v389_v12 }
 0x917   :  { %397 = vrot.lane.b32.xlu0 %v395_v14, %s1620_s29 }
 0x989   :  { %v398_v16 = vpop.permute.xlu0 %397 }
 0x98a   :  { %v400_v17 = vadd.f32 %v398_v16, %v390_v15 }
 0x98c   :  { %1443 = vtanh.f32 %v400_v17 }
 0x992   :  { %v1444_v18 = vpop.eup %1443 }
 0x993   :  { %403 = vrot.lane.b32.xlu1 %v1444_v18, %s1619_s4 }
 0xa05   :  { %v404_v19 = vpop.permute.xlu1 %403 }
 0xa06   :  { %v1787_v20 = vmul.f32 %v404_v19, %v389_v12 }
 0xa08   :  { %v413_v21 = vpack.c.bf16 %v1787_v20, %v1787_v20 }
 0xa0a   :  { %415 = vrot.lane.b32.xlu2 %v413_v21, %s1620_s29 }
 0xa64   :  { %v416_v22 = vpop.permute.xlu2 %415 }
 0xa65   :  { %1341 = vmatmul.msk.bf16.vlgmr.msrb.gmra.mxu3 %vm119_vm3, %v416_v22 }
 0xae8   :  { %v429_v25 = vpop.f32.mrf.mxu3 }
 0xae9   :  { %v433_v26 = vadd.f32 %v429_v25, %v412_v24  ;;  %v542_v24 = vld [vmem:[#allocation2 + $0xc] sm:$0x3] }
 0xaeb   :  { %v1342_v27 = vmul.f32 -1.442695, %v433_v26 }
 0xaed   :  { %1445 = vpow2.f32 %v1342_v27 }
 0xaf0   :  { %v431_v28 = vpop.f32.mrf.mxu3 }
 0xaf3   :  { %v1446_v29 = vpop.eup %1445 }
 0xaf4   :  { %v437_v30 = vadd.f32 1.0, %v1446_v29 }
 0xaf6   :  { %1447 = vrcp.f32 %v437_v30  ;;  %v449_v34 = vand.u32 2147483648, %v437_v30  ;;  %v447_v36 = vand.u32 2147483647, %v437_v30  ;;  %vm443_vm10 = vweird.f32 %v437_v30 }
 0xaf7   :  { %1449 = vtanh.f32 %v433_v26 }
 0xaf8   :  { %v450_v38 = vor.u32 1.1754944e-38, %v449_v34  ;;  %vm448_vm12 = vcmp.eq.f32.partialorder %v447_v36, 8.507059e+37 }
 0xafc   :  { %v1448_v31 = vpop.eup %1447 }
 0xafd   :  { %v439_v32 = vmul.f32 %v1448_v31, %v437_v30  ;;  %vm444_vm9 = vweird.f32 %v1448_v31  ;;  %v1450_v40 = vpop.eup %1449 }
 0xafe   :  { %vm445_vm11 = vmor %vm443_vm10, %vm444_vm9 }
 0xaff   :  { %v440_v33 = vsub.f32 1.0, %v439_v32 }
 0xb01   :  { %v441_v35 = vmul.f32 %v1448_v31, %v440_v33 }
 0xb03   :  { %v442_v37 = vadd.f32 %v1448_v31, %v441_v35 }
 0xb05   :  { %v446_v39 = vsel %vm445_vm11, %v1448_v31, %v442_v37  ;;  %vm215_vm11 = vcmask 254976  }
 0xb06   :  { %v451_v41 = vsel %vm448_vm12, %v450_v38, %v446_v39 }
 0xb07   :  { %v454_v42 = vsel %vm1745_vm7, %v1450_v40, %v451_v41 }
 0xb08   :  { %457 = vrot.lane.b32.xlu0 %v454_v42, %s1619_s4  ;;  %v455_v46 = vmul.f32 %v454_v42, %v400_v17 }
 0xb7a   :  { %v458_v44 = vpop.permute.xlu0 %457 }
 0xb7b   :  { %v460_v45 = vmul.f32 %v458_v44, %v454_v42 }
 0xb7d   :  { %462 = vrot.lane.b32.xlu1 %v460_v45, %s1620_s29 }
 0xbef   :  { %v463_v47 = vpop.permute.xlu1 %462 }
 0xbf0   :  { %v465_v48 = vadd.f32 %v463_v47, %v455_v46 }
 0xbf2   :  { %1451 = vtanh.f32 %v465_v48 }
 0xbf8   :  { %v1452_v49 = vpop.eup %1451 }
 0xbf9   :  { %468 = vrot.lane.b32.xlu2 %v1452_v49, %s1619_s4 }
 0xc53   :  { %v469_v50 = vpop.permute.xlu2 %468 }
 0xc54   :  { %v1798_v51 = vmul.f32 %v469_v50, %v454_v42 }
 0xc56   :  { %v478_v52 = vpack.c.bf16 %v1798_v51, %v1798_v51 }
 0xc58   :  { %480 = vrot.lane.b32.xlu0 %v478_v52, %s1620_s29 }
 0xcca   :  { %v481_v54 = vpop.permute.xlu0 %480 }
 0xccb   :  { %1343 = vmatmul.msk.bf16.vlgmr.msrb.gmra.mxu0 %vm119_vm3, %v481_v54 }
 0xd48   :  { %v494_v56 = vpop.f32.mrf.mxu0 }
 0xd49   :  { %v498_v58 = vadd.f32 %v494_v56, %v477_v55  ;;  %v607_v56 = vld [vmem:[#allocation2 + $0xe] sm:$0x3] }
 0xd4b   :  { %v1344_v59 = vmul.f32 -1.442695, %v498_v58 }
 0xd4d   :  { %1453 = vpow2.f32 %v1344_v59 }
 0xd50   :  { %v496_v60 = vpop.f32.mrf.mxu0 }
 0xd53   :  { %v1454_v61 = vpop.eup %1453 }
 0xd54   :  { %v502_v62 = vadd.f32 1.0, %v1454_v61 }
 0xd56   :  { %1455 = vrcp.f32 %v502_v62  ;;  %v514_v3 = vand.u32 2147483648, %v502_v62  ;;  %v512_v5 = vand.u32 2147483647, %v502_v62  ;;  %vm508_vm14 = vweird.f32 %v502_v62 }
 0xd57   :  { %1457 = vtanh.f32 %v498_v58 }
 0xd58   :  { %v515_v7 = vor.u32 1.1754944e-38, %v514_v3  ;;  %vm513_vm0 = vcmp.eq.f32.partialorder %v512_v5, 8.507059e+37 }
 0xd5c   :  { %v1456_v63 = vpop.eup %1455 }
 0xd5d   :  { %v504_v0 = vmul.f32 %v1456_v63, %v502_v62  ;;  %vm509_vm13 = vweird.f32 %v1456_v63  ;;  %v1458_v9 = vpop.eup %1457 }
 0xd5e   :  { %vm510_vm15 = vmor %vm508_vm14, %vm509_vm13 }
 0xd5f   :  { %v505_v1 = vsub.f32 1.0, %v504_v0 }
 0xd61   :  { %v506_v4 = vmul.f32 %v1456_v63, %v505_v1 }
 0xd63   :  { %v507_v6 = vadd.f32 %v1456_v63, %v506_v4 }
 0xd65   :  { %v511_v8 = vsel %vm510_vm15, %v1456_v63, %v507_v6 }
 0xd66   :  { %v516_v10 = vsel %vm513_vm0, %v515_v7, %v511_v8 }
 0xd67   :  { %v519_v11 = vsel %vm1745_vm7, %v1458_v9, %v516_v10 }
 0xd68   :  { %522 = vrot.lane.b32.xlu1 %v519_v11, %s1619_s4  ;;  %v520_v14 = vmul.f32 %v519_v11, %v465_v48 }
 0xdda   :  { %v523_v12 = vpop.permute.xlu1 %522 }
 0xddb   :  { %v525_v13 = vmul.f32 %v523_v12, %v519_v11 }
 0xddd   :  { %527 = vrot.lane.b32.xlu2 %v525_v13, %s1620_s29 }
 0xe37   :  { %v528_v15 = vpop.permute.xlu2 %527 }
 0xe38   :  { %v530_v16 = vadd.f32 %v528_v15, %v520_v14 }
 0xe3a   :  { %1459 = vtanh.f32 %v530_v16 }
 0xe40   :  { %v1460_v17 = vpop.eup %1459 }
 0xe41   :  { %533 = vrot.lane.b32.xlu0 %v1460_v17, %s1619_s4 }
 0xeb3   :  { %v534_v18 = vpop.permute.xlu0 %533 }
 0xeb4   :  { %v1809_v19 = vmul.f32 %v534_v18, %v519_v11 }
 0xeb6   :  { %v543_v21 = vpack.c.bf16 %v1809_v19, %v1809_v19 }
 0xeb8   :  { %545 = vrot.lane.b32.xlu1 %v543_v21, %s1620_s29 }
 0xf2a   :  { %v546_v22 = vpop.permute.xlu1 %545 }
 0xf2b   :  { %1345 = vmatmul.msk.bf16.vlgmr.msra.gmra.mxu1 %vm119_vm3, %v546_v22 }
 0xfa8   :  { %v559_v25 = vpop.f32.mrf.mxu1 }
 0xfa9   :  { %v563_v26 = vadd.f32 %v559_v25, %v542_v24 }
 0xfab   :  { %v1346_v27 = vmul.f32 -1.442695, %v563_v26 }
 0xfad   :  { %1461 = vpow2.f32 %v1346_v27 }
 0xfb0   :  { %v561_v28 = vpop.f32.mrf.mxu1 }
 0xfb1   :  { %v1396_v28 = vld [vmem:[%s1959_s6] sm:$0xff] }
 0xfb3   :  { %v1462_v29 = vpop.eup %1461 }
 0xfb4   :  { %v567_v30 = vadd.f32 1.0, %v1462_v29 }
 0xfb6   :  { %1463 = vrcp.f32 %v567_v30  ;;  %v579_v34 = vand.u32 2147483648, %v567_v30  ;;  %v577_v36 = vand.u32 2147483647, %v567_v30  ;;  %vm573_vm2 = vweird.f32 %v567_v30 }
 0xfb7   :  { %1465 = vtanh.f32 %v563_v26 }
 0xfb8   :  { %v580_v38 = vor.u32 1.1754944e-38, %v579_v34  ;;  %vm578_vm5 = vcmp.eq.f32.partialorder %v577_v36, 8.507059e+37 }
 0xfbc   :  { %v1464_v31 = vpop.eup %1463 }
 0xfbd   :  { %v569_v32 = vmul.f32 %v1464_v31, %v567_v30  ;;  %vm574_vm1 = vweird.f32 %v1464_v31  ;;  %v1466_v40 = vpop.eup %1465 }
 0xfbe   :  { %vm575_vm4 = vmor %vm573_vm2, %vm574_vm1 }
 0xfbf   :  { %v570_v33 = vsub.f32 1.0, %v569_v32 }
 0xfc1   :  { %v571_v35 = vmul.f32 %v1464_v31, %v570_v33 }
 0xfc3   :  { %v572_v37 = vadd.f32 %v1464_v31, %v571_v35 }
 0xfc5   :  { %v576_v39 = vsel %vm575_vm4, %v1464_v31, %v572_v37 }
 0xfc6   :  { %v581_v41 = vsel %vm578_vm5, %v580_v38, %v576_v39 }
 0xfc7   :  { %v584_v42 = vsel %vm1745_vm7, %v1466_v40, %v581_v41 }
 0xfc8   :  { %587 = vrot.lane.b32.xlu2 %v584_v42, %s1619_s4  ;;  %v585_v46 = vmul.f32 %v584_v42, %v530_v16 }
0x1022   :  { %v588_v44 = vpop.permute.xlu2 %587 }
0x1023   :  { %v590_v45 = vmul.f32 %v588_v44, %v584_v42 }
0x1025   :  { %592 = vrot.lane.b32.xlu0 %v590_v45, %s1620_s29 }
0x1097   :  { %v593_v47 = vpop.permute.xlu0 %592 }
0x1098   :  { %v595_v48 = vadd.f32 %v593_v47, %v585_v46 }
0x109a   :  { %1467 = vtanh.f32 %v595_v48 }
0x10a0   :  { %v1468_v49 = vpop.eup %1467 }
0x10a1   :  { %598 = vrot.lane.b32.xlu1 %v1468_v49, %s1619_s4 }
0x1113   :  { %v599_v50 = vpop.permute.xlu1 %598 }
0x1114   :  { %v601_v52 = vmul.f32 %v599_v50, %v584_v42 }
0x1116   :  { %v608_v54 = vpack.c.bf16 %v601_v52, %v601_v52 }
0x1118   :  { %610 = vrot.lane.b32.xlu2 %v608_v54, %s1620_s29 }
0x1172   :  { %v611_v55 = vpop.permute.xlu2 %610 }
0x1173   :  { %1347 = vmatmul.msk.bf16.vlgmr.msra.gmra.mxu2 %vm119_vm3, %v611_v55 }
0x11f6   :  { %v624_v58 = vpop.f32.mrf.mxu2 }
0x11f7   :  { %v628_v59 = vadd.f32 %v624_v58, %v607_v56 }
0x11f9   :  { %v1348_v60 = vmul.f32 -1.442695, %v628_v59 }
0x11fb   :  { %1469 = vpow2.f32 %v1348_v60 }
0x11fe   :  { %v626_v61 = vpop.f32.mrf.mxu2 }
0x1201   :  { %v1470_v62 = vpop.eup %1469 }
0x1202   :  { %v632_v63 = vadd.f32 1.0, %v1470_v62 }
0x1204   :  { %1471 = vrcp.f32 %v632_v63  ;;  %v644_v4 = vand.u32 2147483648, %v632_v63  ;;  %v642_v6 = vand.u32 2147483647, %v632_v63  ;;  %vm638_vm8 = vweird.f32 %v632_v63 }
0x1205   :  { %1473 = vtanh.f32 %v628_v59 }
0x1206   :  { %v645_v8 = vor.u32 1.1754944e-38, %v644_v4  ;;  %vm643_vm10 = vcmp.eq.f32.partialorder %v642_v6, 8.507059e+37 }
0x120a   :  { %v1472_v0 = vpop.eup %1471 }
0x120b   :  { %v634_v1 = vmul.f32 %v1472_v0, %v632_v63  ;;  %vm639_vm6 = vweird.f32 %v1472_v0  ;;  %v1474_v10 = vpop.eup %1473 }
0x120c   :  { %vm640_vm9 = vmor %vm638_vm8, %vm639_vm6 }
0x120d   :  { %v635_v3 = vsub.f32 1.0, %v634_v1 }
0x120f   :  { %v636_v5 = vmul.f32 %v1472_v0, %v635_v3 }
0x1211   :  { %v637_v7 = vadd.f32 %v1472_v0, %v636_v5 }
0x1213   :  { %v641_v9 = vsel %vm640_vm9, %v1472_v0, %v637_v7 }
0x1214   :  { %v646_v11 = vsel %vm643_vm10, %v645_v8, %v641_v9 }
0x1215   :  { %v649_v12 = vsel %vm1745_vm7, %v1474_v10, %v646_v11 }
0x1216   :  { %652 = vrot.lane.b32.xlu0 %v649_v12, %s1619_s4 }
0x121e   :  { %212 = vrot.lane.b32.xlu0 %v1754_v57, %s1620_s29 }
0x1226   :  { %408 = vrot.lane.b32.xlu0 %v1787_v20, %s1620_s29  ;;  %v650_v20 = vmul.f32 %v649_v12, %v595_v48 }
0x122e   :  { %603 = vrot.lane.b32.xlu0 %v601_v52, %s1620_s29 }
0x1288   :  { %v653_v13 = vpop.permute.xlu0 %652 }
0x1289   :  { %v655_v14 = vmul.f32 %v653_v13, %v649_v12 }
0x128b   :  { %657 = vrot.lane.b32.xlu1 %v655_v14, %s1620_s29 }
0x1290   :  { %v213_v15 = vpop.permute.xlu0 %212 }
0x1291   :  { %216 = vst.msk [vmem:[#allocation3] sm:$0x3] %vm215_vm11, %v213_v15 }
0x1293   :  { %278 = vrot.lane.b32.xlu1 %v1765_v23, %s1620_s29 }
0x1298   :  { %v409_v16 = vpop.permute.xlu0 %408 }
0x1299   :  { %411 = vst.msk [vmem:[#allocation3 + $0x6] sm:$0x3] %vm215_vm11, %v409_v16 }
0x129b   :  { %473 = vrot.lane.b32.xlu1 %v1798_v51, %s1620_s29  ;;  %v1395_v51 = vld [vmem:[%s1958_s5 + $0x8] sm:$0xff] }
0x129c   :  { %710 = vmatpush.bf16.msra.mxu3 %v1395_v51 }
0x12a0   :  { %v604_v57 = vpop.permute.xlu0 %603 }
0x12a1   :  { %606 = vst.msk [vmem:[#allocation3 + $0xc] sm:$0x3] %vm215_vm11, %v604_v57 }
0x12fd   :  { %v658_v17 = vpop.permute.xlu1 %657 }
0x12fe   :  { %v1838_v18 = vadd.f32 %v658_v17, %v650_v20 }
0x1300   :  { %1475 = vtanh.f32 %v1838_v18 }
0x1305   :  { %v279_v21 = vpop.permute.xlu1 %278 }
0x1306   :  { %v1476_v22 = vpop.eup %1475  ;;  %281 = vst.msk [vmem:[#allocation3 + $0x2] sm:$0x3] %vm215_vm11, %v279_v21 }
0x1307   :  { %663 = vrot.lane.b32.xlu2 %v1476_v22, %s1619_s4 }
0x130d   :  { %v474_v23 = vpop.permute.xlu1 %473 }
0x130e   :  { %476 = vst.msk [vmem:[#allocation3 + $0x8] sm:$0x3] %vm215_vm11, %v474_v23 }
0x130f   :  { %343 = vrot.lane.b32.xlu2 %v1776_v53, %s1620_s29  ;;  %v1394_v53 = vld [vmem:[%s1958_s5] sm:$0xff] }
0x1310   :  { %711 = vmatpush.bf16.msra.mxu3 %v1394_v53 }
0x1317   :  { %538 = vrot.lane.b32.xlu2 %v1809_v19, %s1620_s29  ;;  %v1397_v19 = vld [vmem:[%s1959_s6 + $0x8] sm:$0xff] }
0x1318   :  { %743 = vmatpush.bf16.msra.mxu0 %v1397_v19  ;;  %803 = vmatpush.bf16.msrb.mxu1 %v1397_v19 }
0x1319   :  { %863 = vmatpush.bf16.msrb.mxu2 %v1397_v19  ;;  %923 = vmatpush.bf16.msrb.mxu3 %v1397_v19 }
0x131c   :  { %744 = vmatpush.bf16.msra.mxu0 %v1396_v28  ;;  %804 = vmatpush.bf16.msrb.mxu1 %v1396_v28 }
0x131d   :  { %864 = vmatpush.bf16.msrb.mxu2 %v1396_v28  ;;  %924 = vmatpush.bf16.msrb.mxu3 %v1396_v28 }
0x131f   :  { %745 = vmatmul.bf16.vlgmr.msra.gmra.mxu0 %v1617_v2  ;;  %v1411_v2 = vld [vmem:[%s1960_s7] ss:$0 sm:$0xff]  ;;  %s1621_s7 = smov 96  }
0x1320   :  { %983 = vmatpush.bf16.msrb.mxu0 %v1397_v19  ;;  %1043 = vmatpush.bf16.msra.mxu1 %v1397_v19 }
0x1321   :  { %1103 = vmatpush.bf16.msra.mxu2 %v1397_v19 }
0x1324   :  { %984 = vmatpush.bf16.msrb.mxu0 %v1396_v28  ;;  %1044 = vmatpush.bf16.msra.mxu1 %v1396_v28 }
0x1325   :  { %1104 = vmatpush.bf16.msra.mxu2 %v1396_v28 }
0x1328   :  { %1254 = vmatpush.bf16.msra.mxu0 %v1399_v43 }
0x1361   :  { %v664_v24 = vpop.permute.xlu2 %663 }
0x1362   :  { %v666_v25 = vmul.f32 %v664_v24, %v649_v12 }
0x1364   :  { %668 = vrot.lane.b32.xlu1 %v666_v25, %s1620_s29 }
0x1369   :  { %v344_v26 = vpop.permute.xlu2 %343 }
0x136a   :  { %346 = vst.msk [vmem:[#allocation3 + $0x4] sm:$0x3] %vm215_vm11, %v344_v26 }
0x1371   :  { %v539_v27 = vpop.permute.xlu2 %538  ;;  %v672_v30 = vld [vmem:[#allocation3] sm:$0xff] }
0x1372   :  { %541 = vst.msk [vmem:[#allocation3 + $0xa] sm:$0x3] %vm215_vm11, %v539_v27 }
0x139c   :  { %v746_v33 = vpop.f32.mrf.mxu0 }
0x13a4   :  { %v748_v34 = vpop.f32.mrf.mxu0 }
0x13d6   :  { %v669_v29 = vpop.permute.xlu1 %668 }
0x13d7   :  { %671 = vst.msk [vmem:[#allocation3 + $0xe] sm:$0x3] %vm215_vm11, %v669_v29 }
0x13d8   :  { %674 = vst.msk [vmem:[#allocation6] sm:$0x3] %vm215_vm11, %v669_v29 }
0x13de   :  { %v673_v31 = vld [vmem:[#allocation3 + $0x8] sm:$0xff] }
0x13df   :  { %v680_v32 = vpack.c.bf16 %v673_v31, %v672_v30 }
0x13e1   :  { %1357 = vmatmul.msk.bf16.vlgmr.msra.gmra.mxu3 %vm119_vm3, %v680_v32 }
0x13e2   :  { %1163 = vmatpush.bf16.msra.mxu3 %v1397_v19 }
0x13e6   :  { %1164 = vmatpush.bf16.msra.mxu3 %v1396_v28 }
0x1464   :  { %v713_v35 = vpop.f32.mrf.mxu3 }
0x1465   :  { %v714_v36 = vadd.f32 %v1411_v2, %v713_v35 }
0x1467   :  { %718 = vst [vmem:[#allocation2] sm:$0xff] %v714_v36 }
0x146c   :  { %v715_v37 = vpop.f32.mrf.mxu3 }
0x146d   :  { %v716_v38 = vadd.f32 %v1411_v2, %v715_v37 }
0x146e   :  { %v724_v39 = vld [vmem:[#allocation2] sm:$0x3]  ;;  %v789_v7 = vld [vmem:[#allocation2 + $0x2] sm:$0x3]  ;;  %v849_v34 = vld [vmem:[#allocation2 + $0x4] sm:$0x3] }
0x146f   :  { %v750_v40 = vadd.f32 %v746_v33, %v724_v39  ;;  %719 = vst [vmem:[#allocation2 + $0x8] sm:$0xff] %v716_v38 }
0x1471   :  { %v1366_v41 = vmul.f32 -1.442695, %v750_v40 }
0x1473   :  { %1477 = vpow2.f32 %v1366_v41 }
0x1479   :  { %v1478_v42 = vpop.eup %1477 }
0x147a   :  { %v754_v44 = vadd.f32 1.0, %v1478_v42 }
0x147c   :  { %1479 = vrcp.f32 %v754_v44  ;;  %v766_v48 = vand.u32 2147483648, %v754_v44  ;;  %v764_v50 = vand.u32 2147483647, %v754_v44  ;;  %vm760_vm13 = vweird.f32 %v754_v44 }
0x147d   :  { %1481 = vtanh.f32 %v750_v40 }
0x147e   :  { %v767_v54 = vor.u32 1.1754944e-38, %v766_v48  ;;  %vm765_vm15 = vcmp.eq.f32.partialorder %v764_v50, 8.507059e+37 }
0x1482   :  { %v1480_v45 = vpop.eup %1479 }
0x1483   :  { %v756_v46 = vmul.f32 %v1480_v45, %v754_v44  ;;  %vm761_vm12 = vweird.f32 %v1480_v45  ;;  %v1482_v56 = vpop.eup %1481 }
0x1484   :  { %vm762_vm14 = vmor %vm760_vm13, %vm761_vm12 }
0x1485   :  { %v757_v47 = vsub.f32 1.0, %v756_v46 }
0x1487   :  { %v758_v49 = vmul.f32 %v1480_v45, %v757_v47 }
0x1489   :  { %v759_v52 = vadd.f32 %v1480_v45, %v758_v49 }
0x148b   :  { %v763_v55 = vsel %vm762_vm14, %v1480_v45, %v759_v52 }
0x148c   :  { %v768_v58 = vsel %vm765_vm15, %v767_v54, %v763_v55 }
0x148d   :  { %v771_v59 = vsel %vm1745_vm7, %v1482_v56, %v768_v58 }
0x148e   :  { %774 = vrot.lane.b32.xlu2 %v771_v59, %s1619_s4  ;;  %v772_v62 = vmul.f32 0.0, %v771_v59 }
0x14e8   :  { %v775_v60 = vpop.permute.xlu2 %774 }
0x14e9   :  { %v777_v61 = vmul.f32 %v775_v60, %v771_v59 }
0x14eb   :  { %779 = vrot.lane.b32.xlu0 %v777_v61, %s1620_s29 }
0x155d   :  { %v780_v63 = vpop.permute.xlu0 %779 }
0x155e   :  { %v782_v0 = vadd.f32 %v780_v63, %v772_v62 }
0x1560   :  { %1483 = vtanh.f32 %v782_v0 }
0x1566   :  { %v1484_v1 = vpop.eup %1483 }
0x1567   :  { %785 = vrot.lane.b32.xlu1 %v1484_v1, %s1619_s4 }
0x15d9   :  { %v786_v3 = vpop.permute.xlu1 %785 }
0x15da   :  { %v788_v4 = vmul.f32 %v786_v3, %v771_v59  ;;  %v909_v3 = vld [vmem:[#allocation2 + $0x6] sm:$0x3] }
0x15dc   :  { %v790_v5 = vpack.c.bf16 %v788_v4, %v788_v4 }
0x15de   :  { %792 = vrot.lane.b32.xlu2 %v790_v5, %s1620_s29 }
0x1638   :  { %v793_v6 = vpop.permute.xlu2 %792 }
0x1639   :  { %1367 = vmatmul.msk.bf16.vlgmr.msrb.gmra.mxu1 %vm119_vm3, %v793_v6 }
0x16b6   :  { %v806_v8 = vpop.f32.mrf.mxu1 }
0x16b7   :  { %v810_v9 = vadd.f32 %v806_v8, %v789_v7 }
0x16b9   :  { %v1368_v10 = vmul.f32 -1.442695, %v810_v9 }
0x16bb   :  { %1485 = vpow2.f32 %v1368_v10 }
0x16be   :  { %v808_v11 = vpop.f32.mrf.mxu1 }
0x16c1   :  { %v1486_v12 = vpop.eup %1485 }
0x16c2   :  { %v814_v13 = vadd.f32 1.0, %v1486_v12 }
0x16c4   :  { %1487 = vrcp.f32 %v814_v13  ;;  %v826_v57 = vand.u32 2147483648, %v814_v13  ;;  %v824_v17 = vand.u32 2147483647, %v814_v13  ;;  %vm820_vm1 = vweird.f32 %v814_v13 }
0x16c5   :  { %1489 = vtanh.f32 %v810_v9 }
0x16c6   :  { %v827_v22 = vor.u32 1.1754944e-38, %v826_v57  ;;  %vm825_vm4 = vcmp.eq.f32.partialorder %v824_v17, 8.507059e+37 }
0x16ca   :  { %v1488_v14 = vpop.eup %1487 }
0x16cb   :  { %v816_v15 = vmul.f32 %v1488_v14, %v814_v13  ;;  %vm821_vm0 = vweird.f32 %v1488_v14  ;;  %v1490_v51 = vpop.eup %1489 }
0x16cc   :  { %vm822_vm2 = vmor %vm820_vm1, %vm821_vm0 }
0x16cd   :  { %v817_v16 = vsub.f32 1.0, %v816_v15 }
0x16cf   :  { %v818_v20 = vmul.f32 %v1488_v14, %v817_v16 }
0x16d1   :  { %v819_v21 = vadd.f32 %v1488_v14, %v818_v20 }
0x16d3   :  { %v823_v23 = vsel %vm822_vm2, %v1488_v14, %v819_v21 }
0x16d4   :  { %v828_v24 = vsel %vm825_vm4, %v827_v22, %v823_v23 }
0x16d5   :  { %v831_v25 = vsel %vm1745_vm7, %v1490_v51, %v828_v24 }
0x16d6   :  { %834 = vrot.lane.b32.xlu0 %v831_v25, %s1619_s4  ;;  %v832_v53 = vmul.f32 %v831_v25, %v782_v0 }
0x1748   :  { %v835_v26 = vpop.permute.xlu0 %834 }
0x1749   :  { %v837_v27 = vmul.f32 %v835_v26, %v831_v25 }
0x174b   :  { %839 = vrot.lane.b32.xlu1 %v837_v27, %s1620_s29 }
0x17bd   :  { %v840_v19 = vpop.permute.xlu1 %839 }
0x17be   :  { %v842_v28 = vadd.f32 %v840_v19, %v832_v53 }
0x17c0   :  { %1491 = vtanh.f32 %v842_v28 }
0x17c6   :  { %v1492_v29 = vpop.eup %1491 }
0x17c7   :  { %845 = vrot.lane.b32.xlu2 %v1492_v29, %s1619_s4 }
0x1821   :  { %v846_v30 = vpop.permute.xlu2 %845 }
0x1822   :  { %v848_v31 = vmul.f32 %v846_v30, %v831_v25  ;;  %v969_v30 = vld [vmem:[#allocation2 + $0x8] sm:$0x3] }
0x1824   :  { %v850_v32 = vpack.c.bf16 %v848_v31, %v848_v31 }
0x1826   :  { %852 = vrot.lane.b32.xlu0 %v850_v32, %s1620_s29 }
0x1898   :  { %v853_v33 = vpop.permute.xlu0 %852 }
0x1899   :  { %1369 = vmatmul.msk.bf16.vlgmr.msrb.gmra.mxu2 %vm119_vm3, %v853_v33 }
0x191c   :  { %v866_v2 = vpop.f32.mrf.mxu2 }
0x191d   :  { %v870_v35 = vadd.f32 %v866_v2, %v849_v34 }
0x191f   :  { %v1370_v36 = vmul.f32 -1.442695, %v870_v35 }
0x1921   :  { %1493 = vpow2.f32 %v1370_v36 }
0x1924   :  { %v868_v37 = vpop.f32.mrf.mxu2 }
0x1927   :  { %v1494_v38 = vpop.eup %1493 }
0x1928   :  { %v874_v39 = vadd.f32 1.0, %v1494_v38 }
0x192a   :  { %1495 = vrcp.f32 %v874_v39  ;;  %v886_v44 = vand.u32 2147483648, %v874_v39  ;;  %v884_v46 = vand.u32 2147483647, %v874_v39  ;;  %vm880_vm6 = vweird.f32 %v874_v39 }
0x192b   :  { %1497 = vtanh.f32 %v870_v35 }
0x192c   :  { %v887_v48 = vor.u32 1.1754944e-38, %v886_v44  ;;  %vm885_vm9 = vcmp.eq.f32.partialorder %v884_v46, 8.507059e+37 }
0x1930   :  { %v1496_v40 = vpop.eup %1495 }
0x1931   :  { %v876_v41 = vmul.f32 %v1496_v40, %v874_v39  ;;  %vm881_vm5 = vweird.f32 %v1496_v40  ;;  %v1498_v50 = vpop.eup %1497 }
0x1932   :  { %vm882_vm8 = vmor %vm880_vm6, %vm881_vm5 }
0x1933   :  { %v877_v42 = vsub.f32 1.0, %v876_v41 }
0x1935   :  { %v878_v45 = vmul.f32 %v1496_v40, %v877_v42 }
0x1937   :  { %v879_v47 = vadd.f32 %v1496_v40, %v878_v45 }
0x1939   :  { %v883_v49 = vsel %vm882_vm8, %v1496_v40, %v879_v47 }
0x193a   :  { %v888_v52 = vsel %vm885_vm9, %v887_v48, %v883_v49 }
0x193b   :  { %v891_v54 = vsel %vm1745_vm7, %v1498_v50, %v888_v52 }
0x193c   :  { %894 = vrot.lane.b32.xlu1 %v891_v54, %s1619_s4  ;;  %v892_v58 = vmul.f32 %v891_v54, %v842_v28 }
0x19ae   :  { %v895_v55 = vpop.permute.xlu1 %894 }
0x19af   :  { %v897_v56 = vmul.f32 %v895_v55, %v891_v54 }
0x19b1   :  { %899 = vrot.lane.b32.xlu2 %v897_v56, %s1620_s29 }
0x1a0b   :  { %v900_v59 = vpop.permute.xlu2 %899 }
0x1a0c   :  { %v902_v60 = vadd.f32 %v900_v59, %v892_v58 }
0x1a0e   :  { %1499 = vtanh.f32 %v902_v60 }
0x1a14   :  { %v1500_v61 = vpop.eup %1499 }
0x1a15   :  { %905 = vrot.lane.b32.xlu0 %v1500_v61, %s1619_s4 }
0x1a87   :  { %v906_v62 = vpop.permute.xlu0 %905 }
0x1a88   :  { %v908_v63 = vmul.f32 %v906_v62, %v891_v54  ;;  %v1029_v62 = vld [vmem:[#allocation2 + $0xa] sm:$0x3] }
0x1a8a   :  { %v910_v0 = vpack.c.bf16 %v908_v63, %v908_v63 }
0x1a8c   :  { %912 = vrot.lane.b32.xlu1 %v910_v0, %s1620_s29 }
0x1afe   :  { %v913_v1 = vpop.permute.xlu1 %912 }
0x1aff   :  { %1371 = vmatmul.msk.bf16.vlgmr.msrb.gmra.mxu3 %vm119_vm3, %v913_v1 }
0x1b82   :  { %v926_v4 = vpop.f32.mrf.mxu3 }
0x1b83   :  { %v930_v5 = vadd.f32 %v926_v4, %v909_v3 }
0x1b85   :  { %v1372_v6 = vmul.f32 -1.442695, %v930_v5 }
0x1b87   :  { %1501 = vpow2.f32 %v1372_v6 }
0x1b8a   :  { %v928_v7 = vpop.f32.mrf.mxu3 }
0x1b8d   :  { %v1502_v8 = vpop.eup %1501 }
0x1b8e   :  { %v934_v9 = vadd.f32 1.0, %v1502_v8 }
0x1b90   :  { %1503 = vrcp.f32 %v934_v9  ;;  %v946_v13 = vand.u32 2147483648, %v934_v9  ;;  %v944_v15 = vand.u32 2147483647, %v934_v9  ;;  %vm940_vm12 = vweird.f32 %v934_v9 }
0x1b91   :  { %1505 = vtanh.f32 %v930_v5 }
0x1b92   :  { %v947_v57 = vor.u32 1.1754944e-38, %v946_v13  ;;  %vm945_vm14 = vcmp.eq.f32.partialorder %v944_v15, 8.507059e+37 }
0x1b96   :  { %v1504_v10 = vpop.eup %1503 }
0x1b97   :  { %v936_v11 = vmul.f32 %v1504_v10, %v934_v9  ;;  %vm941_vm10 = vweird.f32 %v1504_v10  ;;  %v1506_v17 = vpop.eup %1505 }
0x1b98   :  { %vm942_vm13 = vmor %vm940_vm12, %vm941_vm10 }
0x1b99   :  { %v937_v12 = vsub.f32 1.0, %v936_v11 }
0x1b9b   :  { %v938_v14 = vmul.f32 %v1504_v10, %v937_v12 }
0x1b9d   :  { %v939_v16 = vadd.f32 %v1504_v10, %v938_v14 }
0x1b9f   :  { %v943_v20 = vsel %vm942_vm13, %v1504_v10, %v939_v16 }
0x1ba0   :  { %v948_v21 = vsel %vm945_vm14, %v947_v57, %v943_v20 }
0x1ba1   :  { %v951_v22 = vsel %vm1745_vm7, %v1506_v17, %v948_v21 }
0x1ba2   :  { %954 = vrot.lane.b32.xlu2 %v951_v22, %s1619_s4  ;;  %v952_v24 = vmul.f32 %v951_v22, %v902_v60 }
0x1bfc   :  { %v955_v23 = vpop.permute.xlu2 %954 }
0x1bfd   :  { %v957_v51 = vmul.f32 %v955_v23, %v951_v22 }
0x1bff   :  { %959 = vrot.lane.b32.xlu0 %v957_v51, %s1620_s29 }
0x1c71   :  { %v960_v25 = vpop.permute.xlu0 %959 }
0x1c72   :  { %v962_v26 = vadd.f32 %v960_v25, %v952_v24 }
0x1c74   :  { %1507 = vtanh.f32 %v962_v26 }
0x1c7a   :  { %v1508_v27 = vpop.eup %1507 }
0x1c7b   :  { %965 = vrot.lane.b32.xlu1 %v1508_v27, %s1619_s4 }
0x1ced   :  { %v966_v53 = vpop.permute.xlu1 %965 }
0x1cee   :  { %v968_v19 = vmul.f32 %v966_v53, %v951_v22  ;;  %v1089_v53 = vld [vmem:[#allocation2 + $0xc] sm:$0x3] }
0x1cf0   :  { %v970_v28 = vpack.c.bf16 %v968_v19, %v968_v19 }
0x1cf2   :  { %972 = vrot.lane.b32.xlu2 %v970_v28, %s1620_s29 }
0x1d4c   :  { %v973_v29 = vpop.permute.xlu2 %972 }
0x1d4d   :  { %1373 = vmatmul.msk.bf16.vlgmr.msrb.gmra.mxu0 %vm119_vm3, %v973_v29 }
0x1dca   :  { %v986_v31 = vpop.f32.mrf.mxu0 }
0x1dcb   :  { %v990_v32 = vadd.f32 %v986_v31, %v969_v30 }
0x1dcd   :  { %v1374_v33 = vmul.f32 -1.442695, %v990_v32 }
0x1dcf   :  { %1509 = vpow2.f32 %v1374_v33 }
0x1dd2   :  { %v988_v34 = vpop.f32.mrf.mxu0 }
0x1dd5   :  { %v1510_v2 = vpop.eup %1509 }
0x1dd6   :  { %v994_v35 = vadd.f32 1.0, %v1510_v2 }
0x1dd8   :  { %1511 = vrcp.f32 %v994_v35  ;;  %v1006_v39 = vand.u32 2147483648, %v994_v35  ;;  %v1004_v41 = vand.u32 2147483647, %v994_v35  ;;  %vm1000_vm0 = vweird.f32 %v994_v35 }
0x1dd9   :  { %1513 = vtanh.f32 %v990_v32 }
0x1dda   :  { %v1007_v44 = vor.u32 1.1754944e-38, %v1006_v39  ;;  %vm1005_vm2 = vcmp.eq.f32.partialorder %v1004_v41, 8.507059e+37 }
0x1dde   :  { %v1512_v36 = vpop.eup %1511 }
0x1ddf   :  { %v996_v37 = vmul.f32 %v1512_v36, %v994_v35  ;;  %vm1001_vm15 = vweird.f32 %v1512_v36  ;;  %v1514_v46 = vpop.eup %1513 }
0x1de0   :  { %vm1002_vm1 = vmor %vm1000_vm0, %vm1001_vm15 }
0x1de1   :  { %v997_v38 = vsub.f32 1.0, %v996_v37 }
0x1de3   :  { %v998_v40 = vmul.f32 %v1512_v36, %v997_v38 }
0x1de5   :  { %v999_v42 = vadd.f32 %v1512_v36, %v998_v40 }
0x1de7   :  { %v1003_v45 = vsel %vm1002_vm1, %v1512_v36, %v999_v42 }
0x1de8   :  { %v1008_v47 = vsel %vm1005_vm2, %v1007_v44, %v1003_v45 }
0x1de9   :  { %v1011_v48 = vsel %vm1745_vm7, %v1514_v46, %v1008_v47 }
0x1dea   :  { %1014 = vrot.lane.b32.xlu0 %v1011_v48, %s1619_s4  ;;  %v1012_v52 = vmul.f32 %v1011_v48, %v962_v26 }
0x1e5c   :  { %v1015_v49 = vpop.permute.xlu0 %1014 }
0x1e5d   :  { %v1017_v50 = vmul.f32 %v1015_v49, %v1011_v48 }
0x1e5f   :  { %1019 = vrot.lane.b32.xlu1 %v1017_v50, %s1620_s29 }
0x1ed1   :  { %v1020_v54 = vpop.permute.xlu1 %1019 }
0x1ed2   :  { %v1022_v55 = vadd.f32 %v1020_v54, %v1012_v52 }
0x1ed4   :  { %1515 = vtanh.f32 %v1022_v55 }
0x1eda   :  { %v1516_v56 = vpop.eup %1515 }
0x1edb   :  { %1025 = vrot.lane.b32.xlu2 %v1516_v56, %s1619_s4 }
0x1f35   :  { %v1026_v58 = vpop.permute.xlu2 %1025 }
0x1f36   :  { %v1028_v59 = vmul.f32 %v1026_v58, %v1011_v48  ;;  %v1149_v58 = vld [vmem:[#allocation2 + $0xe] sm:$0x3] }
0x1f38   :  { %v1030_v60 = vpack.c.bf16 %v1028_v59, %v1028_v59 }
0x1f3a   :  { %1032 = vrot.lane.b32.xlu0 %v1030_v60, %s1620_s29 }
0x1fac   :  { %v1033_v61 = vpop.permute.xlu0 %1032 }
0x1fad   :  { %1375 = vmatmul.msk.bf16.vlgmr.msra.gmra.mxu1 %vm119_vm3, %v1033_v61 }
0x202a   :  { %v1046_v63 = vpop.f32.mrf.mxu1 }
0x202b   :  { %v1050_v0 = vadd.f32 %v1046_v63, %v1029_v62 }
0x202d   :  { %v1376_v1 = vmul.f32 -1.442695, %v1050_v0 }
0x202f   :  { %1517 = vpow2.f32 %v1376_v1 }
0x2032   :  { %v1048_v3 = vpop.f32.mrf.mxu1 }
0x2035   :  { %v1518_v4 = vpop.eup %1517 }
0x2036   :  { %v1054_v5 = vadd.f32 1.0, %v1518_v4 }
0x2038   :  { %1519 = vrcp.f32 %v1054_v5  ;;  %v1066_v9 = vand.u32 2147483648, %v1054_v5  ;;  %v1064_v11 = vand.u32 2147483647, %v1054_v5  ;;  %vm1060_vm5 = vweird.f32 %v1054_v5 }
0x2039   :  { %1521 = vtanh.f32 %v1050_v0 }
0x203a   :  { %v1067_v13 = vor.u32 1.1754944e-38, %v1066_v9  ;;  %vm1065_vm8 = vcmp.eq.f32.partialorder %v1064_v11, 8.507059e+37 }
0x203e   :  { %v1520_v6 = vpop.eup %1519 }
0x203f   :  { %v1056_v7 = vmul.f32 %v1520_v6, %v1054_v5  ;;  %vm1061_vm4 = vweird.f32 %v1520_v6  ;;  %v1522_v15 = vpop.eup %1521 }
0x2040   :  { %vm1062_vm6 = vmor %vm1060_vm5, %vm1061_vm4 }
0x2041   :  { %v1057_v8 = vsub.f32 1.0, %v1056_v7 }
0x2043   :  { %v1058_v10 = vmul.f32 %v1520_v6, %v1057_v8 }
0x2045   :  { %v1059_v12 = vadd.f32 %v1520_v6, %v1058_v10 }
0x2047   :  { %v1063_v14 = vsel %vm1062_vm6, %v1520_v6, %v1059_v12 }
0x2048   :  { %v1068_v16 = vsel %vm1065_vm8, %v1067_v13, %v1063_v14 }
0x2049   :  { %v1071_v57 = vsel %vm1745_vm7, %v1522_v15, %v1068_v16 }
0x204a   :  { %1074 = vrot.lane.b32.xlu1 %v1071_v57, %s1619_s4  ;;  %v1072_v21 = vmul.f32 %v1071_v57, %v1022_v55 }
0x20bc   :  { %v1075_v20 = vpop.permute.xlu1 %1074 }
0x20bd   :  { %v1077_v17 = vmul.f32 %v1075_v20, %v1071_v57 }
0x20bf   :  { %1079 = vrot.lane.b32.xlu2 %v1077_v17, %s1620_s29 }
0x2119   :  { %v1080_v22 = vpop.permute.xlu2 %1079 }
0x211a   :  { %v1082_v23 = vadd.f32 %v1080_v22, %v1072_v21  ;;  %v1398_v21 = vld [vmem:[%s1961_s8] sm:$0xff] }
0x211b   :  { %1255 = vmatpush.bf16.msra.mxu0 %v1398_v21 }
0x211c   :  { %1523 = vtanh.f32 %v1082_v23 }
0x2122   :  { %v1524_v51 = vpop.eup %1523 }
0x2123   :  { %1085 = vrot.lane.b32.xlu0 %v1524_v51, %s1619_s4 }
0x2195   :  { %v1086_v24 = vpop.permute.xlu0 %1085 }
0x2196   :  { %v1088_v25 = vmul.f32 %v1086_v24, %v1071_v57 }
0x2198   :  { %v1090_v26 = vpack.c.bf16 %v1088_v25, %v1088_v25 }
0x219a   :  { %1092 = vrot.lane.b32.xlu1 %v1090_v26, %s1620_s29 }
0x220c   :  { %v1093_v27 = vpop.permute.xlu1 %1092 }
0x220d   :  { %1377 = vmatmul.msk.bf16.vlgmr.msra.gmra.mxu2 %vm119_vm3, %v1093_v27  ;;  %v1412_v27 = vld [vmem:[%s1962_s9] ss:$0 sm:$0xff] }
0x2290   :  { %v1106_v19 = vpop.f32.mrf.mxu2 }
0x2291   :  { %v1110_v28 = vadd.f32 %v1106_v19, %v1089_v53 }
0x2293   :  { %v1378_v29 = vmul.f32 -1.442695, %v1110_v28 }
0x2295   :  { %1525 = vpow2.f32 %v1378_v29 }
0x2298   :  { %v1108_v30 = vpop.f32.mrf.mxu2 }
0x229b   :  { %v1526_v31 = vpop.eup %1525 }
0x229c   :  { %v1114_v32 = vadd.f32 1.0, %v1526_v31 }
0x229e   :  { %1527 = vrcp.f32 %v1114_v32  ;;  %v1126_v35 = vand.u32 2147483648, %v1114_v32  ;;  %v1124_v37 = vand.u32 2147483647, %v1114_v32  ;;  %vm1120_vm10 = vweird.f32 %v1114_v32 }
0x229f   :  { %1529 = vtanh.f32 %v1110_v28 }
0x22a0   :  { %v1127_v39 = vor.u32 1.1754944e-38, %v1126_v35  ;;  %vm1125_vm13 = vcmp.eq.f32.partialorder %v1124_v37, 8.507059e+37 }
0x22a4   :  { %v1528_v33 = vpop.eup %1527 }
0x22a5   :  { %v1116_v34 = vmul.f32 %v1528_v33, %v1114_v32  ;;  %vm1121_vm9 = vweird.f32 %v1528_v33  ;;  %v1530_v41 = vpop.eup %1529 }
0x22a6   :  { %vm1122_vm12 = vmor %vm1120_vm10, %vm1121_vm9 }
0x22a7   :  { %v1117_v2 = vsub.f32 1.0, %v1116_v34 }
0x22a9   :  { %v1118_v36 = vmul.f32 %v1528_v33, %v1117_v2 }
0x22ab   :  { %v1119_v38 = vadd.f32 %v1528_v33, %v1118_v36 }
0x22ad   :  { %v1123_v40 = vsel %vm1122_vm12, %v1528_v33, %v1119_v38 }
0x22ae   :  { %v1128_v42 = vsel %vm1125_vm13, %v1127_v39, %v1123_v40 }
0x22af   :  { %v1131_v44 = vsel %vm1745_vm7, %v1530_v41, %v1128_v42 }
0x22b0   :  { %1134 = vrot.lane.b32.xlu2 %v1131_v44, %s1619_s4  ;;  %v1132_v47 = vmul.f32 %v1131_v44, %v1082_v23 }
0x230a   :  { %v1135_v45 = vpop.permute.xlu2 %1134 }
0x230b   :  { %v1137_v46 = vmul.f32 %v1135_v45, %v1131_v44 }
0x230d   :  { %1139 = vrot.lane.b32.xlu0 %v1137_v46, %s1620_s29 }
0x237f   :  { %v1140_v48 = vpop.permute.xlu0 %1139 }
0x2380   :  { %v1142_v49 = vadd.f32 %v1140_v48, %v1132_v47 }
0x2382   :  { %1531 = vtanh.f32 %v1142_v49 }
0x2388   :  { %v1532_v50 = vpop.eup %1531 }
0x2389   :  { %1145 = vrot.lane.b32.xlu1 %v1532_v50, %s1619_s4 }
0x23fb   :  { %v1146_v52 = vpop.permute.xlu1 %1145 }
0x23fc   :  { %v1148_v54 = vmul.f32 %v1146_v52, %v1131_v44 }
0x23fe   :  { %v1150_v55 = vpack.c.bf16 %v1148_v54, %v1148_v54 }
0x2400   :  { %1152 = vrot.lane.b32.xlu2 %v1150_v55, %s1620_s29 }
0x245a   :  { %v1153_v56 = vpop.permute.xlu2 %1152 }
0x245b   :  { %1379 = vmatmul.msk.bf16.vlgmr.msra.gmra.mxu3 %vm119_vm3, %v1153_v56 }
0x24de   :  { %v1166_v59 = vpop.f32.mrf.mxu3 }
0x24df   :  { %v1170_v60 = vadd.f32 %v1166_v59, %v1149_v58 }
0x24e1   :  { %v1380_v61 = vmul.f32 -1.442695, %v1170_v60 }
0x24e3   :  { %1533 = vpow2.f32 %v1380_v61 }
0x24e6   :  { %v1168_v62 = vpop.f32.mrf.mxu3 }
0x24e9   :  { %v1534_v63 = vpop.eup %1533 }
0x24ea   :  { %v1174_v0 = vadd.f32 1.0, %v1534_v63 }
0x24ec   :  { %1535 = vrcp.f32 %v1174_v0  ;;  %v1186_v5 = vand.u32 2147483648, %v1174_v0  ;;  %v1184_v7 = vand.u32 2147483647, %v1174_v0  ;;  %vm1180_vm15 = vweird.f32 %v1174_v0 }
0x24ed   :  { %1537 = vtanh.f32 %v1170_v60 }
0x24ee   :  { %v1187_v9 = vor.u32 1.1754944e-38, %v1186_v5  ;;  %vm1185_vm1 = vcmp.eq.f32.partialorder %v1184_v7, 8.507059e+37 }
0x24f2   :  { %v1536_v1 = vpop.eup %1535 }
0x24f3   :  { %v1176_v3 = vmul.f32 %v1536_v1, %v1174_v0  ;;  %vm1181_vm14 = vweird.f32 %v1536_v1  ;;  %v1538_v11 = vpop.eup %1537 }
0x24f4   :  { %vm1182_vm0 = vmor %vm1180_vm15, %vm1181_vm14 }
0x24f5   :  { %v1177_v4 = vsub.f32 1.0, %v1176_v3 }
0x24f7   :  { %v1178_v6 = vmul.f32 %v1536_v1, %v1177_v4 }
0x24f9   :  { %v1179_v8 = vadd.f32 %v1536_v1, %v1178_v6 }
0x24fb   :  { %v1183_v10 = vsel %vm1182_vm0, %v1536_v1, %v1179_v8 }
0x24fc   :  { %v1188_v12 = vsel %vm1185_vm1, %v1187_v9, %v1183_v10 }
0x24fd   :  { %v1191_v13 = vsel %vm1745_vm7, %v1538_v11, %v1188_v12 }
0x24fe   :  { %1194 = vrot.lane.b32.xlu0 %v1191_v13, %s1619_s4  ;;  %v1192_v16 = vmul.f32 %v1191_v13, %v1142_v49 }
0x2570   :  { %v1195_v14 = vpop.permute.xlu0 %1194 }
0x2571   :  { %v1197_v15 = vmul.f32 %v1195_v14, %v1191_v13 }
0x2573   :  { %1199 = vrot.lane.b32.xlu1 %v1197_v15, %s1620_s29 }
0x25e5   :  { %v1200_v57 = vpop.permute.xlu1 %1199 }
0x25e6   :  { %v1202_v20 = vadd.f32 %v1200_v57, %v1192_v16 }
0x25e8   :  { %1539 = vtanh.f32 %v1202_v20 }
0x25ee   :  { %v1540_v17 = vpop.eup %1539 }
0x25ef   :  { %1205 = vrot.lane.b32.xlu2 %v1540_v17, %s1619_s4  ;;  %s1292_s4 = sshll.u32 %s1965_s12, 4  ;;  %s1293_s4 = int_to_ptr.hbm [resolvable:$true] %s1292_s4 }
0x25f7   :  { %676 = vrot.lane.b32.xlu2 %v1838_v18, %s1621_s7 }
0x2649   :  { %v1206_v22 = vpop.permute.xlu2 %1205 }
0x264a   :  { %v1208_v23 = vmul.f32 %v1206_v22, %v1191_v13 }
0x264c   :  { %v1221_v51 = vpack.c.bf16 %v1208_v23, %v1208_v23  ;;  %1210 = vrot.lane.b32.xlu1 %v1208_v23, %s1620_s29 }
0x264e   :  { %1231 = vrot.lane.b32.xlu0 %v1221_v51, %s1620_s29 }
0x2651   :  { %v677_v24 = vpop.permute.xlu2 %676 }
0x2652   :  { %679 = vst.msk [vmem:[#allocation8] sm:$0x3] %vm215_vm11, %v677_v24 }
0x2656   :  { %1216 = vrot.lane.b32.xlu0 %v1202_v20, %s1621_s7 }
0x26be   :  { %v1211_v18 = vpop.permute.xlu1 %1210 }
0x26bf   :  { %1214 = vst.msk [vmem:[#allocation6 + $0x2] sm:$0x3] %vm215_vm11, %v1211_v18 }
0x26c0   :  { %v1232_v25 = vpop.permute.xlu0 %1231  ;;  %1285 = dma.vmem_to_hbm [thread:$0]  %s1278_s25, 64, %s1280_s1, [#allocation7], %s1620_s29, %s1620_s29, %s1623_s26  }
0x26c1   :  { %1389 = vmatmul.msk.bf16.vlgmr.msra.gmra.mxu0 %vm119_vm3, %v1232_v25 }
0x26c8   :  { %v1217_v26 = vpop.permute.xlu0 %1216 }
0x26c9   :  { %1220 = vst.msk [vmem:[#allocation8 + $0x2] sm:$0x3] %vm215_vm11, %v1217_v26 }
0x26ca   :  { %1298 = dma.vmem_to_hbm [thread:$0]  %s1291_s28, 64, %s1293_s4, [#allocation7], %s1620_s29, %s1620_s29, %s1623_s26  }
0x273e   :  { %v1257_v53 = vpop.f32.mrf.mxu0 }
0x273f   :  { %v1258_v19 = vadd.f32 %v1412_v27, %v1257_v53 }
0x2741   :  { %1261 = vst [vmem:[#allocation4] sm:$0x3] %v1258_v19 }
0x2742   :  { %1272 = dma.vmem_to_hbm [thread:$0]  %s1268_s14, 32, %s1270_s17, [#allocation5]  }
0x2746   :  { %v1259_v28 = vpop.f32.mrf.mxu0 }
0x2747   :  { %1613 = dma.done.wait [#allocation5], 32  }
0x2748   :  { %1614 = vsyncadd [#allocation5], 4294967264 }
0x2749   :  { %1615 = dma.done.wait [#allocation7], 128  }
0x274a   :  { %1616 = vsyncadd [#allocation7], 4294967168 }
0x274b   :  { %1311 = vsyncpa [#allocation5], 1 }
0x274c   :  { %1312 = vsyncpa [#allocation7], 1 }

</bundles_post_ra>
